<compile_context>
chip_gen: v7x
topology: tpu7x:2x2x1
jax: 0.10.0
libtpu: 0.0.40
codegen_flags: <defaults>
</compile_context>

<pallas_src>
import jax
import jax.numpy as jnp
from jax import lax
from jax.experimental import pallas as pl
from jax.experimental.pallas import tpu as pltpu

B, C, H, W = 2, 16, 16, 16     # small synthetic shapes (NCHW, like PyTorch)
HW = H * W
RATIO = 8
HID = C // RATIO               # channel-attention bottleneck
K = 7                          # spatial-attention conv kernel size
P = 3                          # padding for the 7x7 conv


def _roll_lanes(a, shift):
    """Static circular roll along the last (lane) axis; jnp.roll semantics."""
    n = a.shape[-1]
    s = (-shift) % n
    if s == 0:
        return a
    return jnp.concatenate([a[..., s:], a[..., :s]], axis=-1)


def cbam_kernel(x_ref, g_ref, w1t_ref, w2_ref, o_ref):
    # x_ref  : VMEM (B, C, HW)         input with flattened spatial dims
    # g_ref  : VMEM (K*K, 2B, HW) f32  masked spatial-conv weights per tap/lane
    # w1t_ref: VMEM (C, HID) f32       fc1 weight, transposed
    # w2_ref : VMEM (C, HID) f32       fc2 weight
    # o_ref  : VMEM (B, C, HW)
    x = x_ref[...].astype(jnp.float32)                      # (B, C, HW)

    # ---------------- Spatial attention ----------------
    avg_p = jnp.mean(x, axis=1)                             # (B, HW) channel mean
    max_p = jnp.max(x, axis=1)                              # (B, HW) channel max
    packed = jnp.concatenate([avg_p, max_p], axis=0)        # (2B, HW)

    # 7 hoisted dx lane-rolls of the packed maps, reused across all dy.
    rolled = [_roll_lanes(packed, P - dx) for dx in range(K)]

    conv = jnp.zeros((2 * B, HW), jnp.float32)
    for dy in range(K):
        acc = jnp.zeros((2 * B, HW), jnp.float32)
        for dx in range(K):
            # masked lane-weights * shifted taps; weights loaded per tap.
            acc = acc + g_ref[dy * K + dx] * rolled[dx]
        conv = conv + _roll_lanes(acc, (P - dy) * W)        # apply dy offset once
    conv = conv[0:B] + conv[B:2 * B]                        # sum avg + max planes
    sa = jax.nn.sigmoid(conv)                               # (B, HW)

    x1 = x * sa[:, None, :]                                 # x * spatial attention

    # ---------------- Channel attention (on x1) ----------------
    avg_c = jnp.mean(x1, axis=2, keepdims=True)             # (B, C, 1)
    max_c = jnp.max(x1, axis=2, keepdims=True)              # (B, C, 1)
    p = jnp.concatenate([avg_c, max_c], axis=0)             # (2B, C, 1)

    w1t = w1t_ref[...]                                      # (C, HID)
    w2 = w2_ref[...]                                        # (C, HID)
    mlp_out = jnp.zeros((2 * B, C, 1), jnp.float32)
    for j in range(HID):                                    # tiny MLP on the VPU
        hj = jnp.sum(p * w1t[None, :, j:j + 1], axis=1, keepdims=True)  # (2B,1,1)
        hj = jnp.maximum(hj, 0.0)                           # ReLU
        mlp_out = mlp_out + hj * w2[None, :, j:j + 1]       # (2B, C, 1)
    ca = jax.nn.sigmoid(mlp_out[0:B] + mlp_out[B:2 * B])    # (B, C, 1)

    # Single lane-dense store of the whole result.
    o_ref[...] = (x1 * ca).astype(o_ref.dtype)


def _spatial_tap_weights(w_spatial):
    """Per-tap, per-lane masked weights for the 7x7 conv in flattened layout.

    Returns (K*K, 2*B, HW) f32 where, for tap t = dy*K + dx, rows [0:B] carry
    the avg-channel weight and rows [B:2B] the max-channel weight, zeroed on
    lanes whose tap would read outside the (H, W) image.  This replaces both
    the in-kernel zero padding and the 98 scalar-weight splats.
    """
    lane = jnp.arange(HW)
    row = lane // W
    col = lane % W
    dy = jnp.arange(K)[:, None]
    dx = jnp.arange(K)[:, None]
    # Row mask is expressed at the pre-(dy-roll) lane position, column mask at
    # the post-(dx-roll) position -- matches the two-stage roll in the kernel.
    r_ok = ((row[None, :] - (dy - P)) >= 0) & ((row[None, :] - (dy - P)) < H)  # (K, HW)
    c_ok = ((col[None, :] + (dx - P)) >= 0) & ((col[None, :] + (dx - P)) < W)  # (K, HW)
    mask = (r_ok[:, None, :] & c_ok[None, :, :]).astype(jnp.float32)           # (K, K, HW)
    g = w_spatial.astype(jnp.float32)[:, :, :, None] * mask[None]              # (2, K, K, HW)
    g = jnp.transpose(g, (1, 2, 0, 3))                                         # (K, K, 2, HW)
    g = jnp.broadcast_to(g[:, :, :, None, :], (K, K, 2, B, HW))                # share over batch
    return g.reshape(K * K, 2 * B, HW)


@jax.jit
def cbam_sc_block(x, w_spatial, w_fc1, w_fc2):
    x_flat = x.reshape(B, C, HW)                       # lane-dense layout
    g = _spatial_tap_weights(w_spatial)                # (K*K, 2B, HW)
    w1t = w_fc1.astype(jnp.float32).T                  # (C, HID)
    w2 = w_fc2.astype(jnp.float32)                     # (C, HID)
    vmem = pl.BlockSpec(memory_space=pltpu.MemorySpace.VMEM)
    out_flat = pl.pallas_call(
        cbam_kernel,
        out_shape=jax.ShapeDtypeStruct((B, C, HW), x.dtype),
        in_specs=[vmem, vmem, vmem, vmem],
        out_specs=vmem,
    )(x_flat, g, w1t, w2)
    return out_flat.reshape(B, C, H, W)


def reference(x, w_spatial, w_fc1, w_fc2):
    # Pure-JAX reproduction of the PyTorch forward (for validation).
    avg = jnp.mean(x, axis=1, keepdims=True)
    mx = jnp.max(x, axis=1, keepdims=True)
    sa_in = jnp.concatenate([avg, mx], axis=1)               # (B,2,H,W)
    conv = lax.conv_general_dilated(
        sa_in, w_spatial[None],                              # (1,2,K,K)
        window_strides=(1, 1), padding=((P, P), (P, P)),
        dimension_numbers=("NCHW", "OIHW", "NCHW"))
    x1 = x * jax.nn.sigmoid(conv)
    avg_c = jnp.mean(x1, axis=(2, 3))
    max_c = jnp.max(x1, axis=(2, 3))

    def mlp(v):
        return jnp.maximum(v @ w_fc1.T, 0.0) @ w_fc2.T

    ca = jax.nn.sigmoid(mlp(avg_c) + mlp(max_c))             # (B,C)
    return x1 * ca[:, :, None, None]


if __name__ == "__main__":
    key = jax.random.PRNGKey(0)
    kx, k1, k2, k3 = jax.random.split(key, 4)
    x = jax.random.normal(kx, (B, C, H, W), jnp.float32)
    # PyTorch parameter shapes: conv (1,2,7,7) squeezed to (2,7,7);
    # fc1 (C//r, C, 1, 1) -> (HID, C); fc2 (C, C//r, 1, 1) -> (C, HID).
    w_spatial = jax.random.normal(k1, (2, K, K), jnp.float32) * 0.1
    w_fc1 = jax.random.normal(k2, (HID, C), jnp.float32) * 0.2
    w_fc2 = jax.random.normal(k3, (C, HID), jnp.float32) * 0.2

    out = jax.block_until_ready(cbam_sc_block(x, w_spatial, w_fc1, w_fc2))

    ref = reference(x, w_spatial, w_fc1, w_fc2)
    err = float(jnp.max(jnp.abs(out - ref)))
    assert jnp.allclose(out, ref, atol=2e-3, rtol=2e-3), f"max abs err = {err}"
    print("KERNEL_OK")
</pallas_src>

<mosaic_0001>
module attributes {stable_mosaic.version = 11 : i64} {
  func.func @cbam_kernel(%arg0: memref<2x16x256xf32, #tpu.memory_space<vmem>>, %arg1: memref<49x4x256xf32, #tpu.memory_space<vmem>>, %arg2: memref<16x2xf32, #tpu.memory_space<vmem>>, %arg3: memref<16x2xf32, #tpu.memory_space<vmem>>, %arg4: memref<2x16x256xf32, #tpu.memory_space<vmem>>) attributes {dimension_semantics = [], scalar_prefetch = 0 : i64, scratch_operands = 0 : i64, tpu.core_type = #tpu.core_type<tc>} {
    %c0 = arith.constant 0 : index
    %c0_0 = arith.constant 0 : index
    %c0_1 = arith.constant 0 : index
    %0 = vector.load %arg0[%c0, %c0_0, %c0_1] : memref<2x16x256xf32, #tpu.memory_space<vmem>>, vector<2x16x256xf32>
    %cst = arith.constant dense<0.000000e+00> : vector<2x256xf32>
    %1 = vector.multi_reduction <add>, %0, %cst [1] : vector<2x16x256xf32> to vector<2x256xf32>
    %cst_2 = arith.constant 1.600000e+01 : f32
    %2 = vector.broadcast %cst_2 : f32 to vector<2x256xf32>
    %3 = arith.divf %1, %2 : vector<2x256xf32>
    %cst_3 = arith.constant dense<0xFF800000> : vector<2x256xf32>
    %4 = vector.multi_reduction <maximumf>, %0, %cst_3 [1] : vector<2x16x256xf32> to vector<2x256xf32>
    %5 = tpu.concatenate %3, %4 in 0 : vector<2x256xf32>, vector<2x256xf32> -> vector<4x256xf32>
    %6 = vector.extract_strided_slice %5 {offsets = [0, 253], sizes = [4, 3], strides = [1, 1]} : vector<4x256xf32> to vector<4x3xf32>
    %7 = vector.extract_strided_slice %5 {offsets = [0, 0], sizes = [4, 253], strides = [1, 1]} : vector<4x256xf32> to vector<4x253xf32>
    %8 = tpu.concatenate %6, %7 in 1 : vector<4x3xf32>, vector<4x253xf32> -> vector<4x256xf32>
    %9 = vector.extract_strided_slice %5 {offsets = [0, 254], sizes = [4, 2], strides = [1, 1]} : vector<4x256xf32> to vector<4x2xf32>
    %10 = vector.extract_strided_slice %5 {offsets = [0, 0], sizes = [4, 254], strides = [1, 1]} : vector<4x256xf32> to vector<4x254xf32>
    %11 = tpu.concatenate %9, %10 in 1 : vector<4x2xf32>, vector<4x254xf32> -> vector<4x256xf32>
    %12 = vector.extract_strided_slice %5 {offsets = [0, 255], sizes = [4, 1], strides = [1, 1]} : vector<4x256xf32> to vector<4x1xf32>
    %13 = vector.extract_strided_slice %5 {offsets = [0, 0], sizes = [4, 255], strides = [1, 1]} : vector<4x256xf32> to vector<4x255xf32>
    %14 = tpu.concatenate %12, %13 in 1 : vector<4x1xf32>, vector<4x255xf32> -> vector<4x256xf32>
    %15 = vector.extract_strided_slice %5 {offsets = [0, 1], sizes = [4, 255], strides = [1, 1]} : vector<4x256xf32> to vector<4x255xf32>
    %16 = vector.extract_strided_slice %5 {offsets = [0, 0], sizes = [4, 1], strides = [1, 1]} : vector<4x256xf32> to vector<4x1xf32>
    %17 = tpu.concatenate %15, %16 in 1 : vector<4x255xf32>, vector<4x1xf32> -> vector<4x256xf32>
    %18 = vector.extract_strided_slice %5 {offsets = [0, 2], sizes = [4, 254], strides = [1, 1]} : vector<4x256xf32> to vector<4x254xf32>
    %19 = vector.extract_strided_slice %5 {offsets = [0, 0], sizes = [4, 2], strides = [1, 1]} : vector<4x256xf32> to vector<4x2xf32>
    %20 = tpu.concatenate %18, %19 in 1 : vector<4x254xf32>, vector<4x2xf32> -> vector<4x256xf32>
    %21 = vector.extract_strided_slice %5 {offsets = [0, 3], sizes = [4, 253], strides = [1, 1]} : vector<4x256xf32> to vector<4x253xf32>
    %22 = vector.extract_strided_slice %5 {offsets = [0, 0], sizes = [4, 3], strides = [1, 1]} : vector<4x256xf32> to vector<4x3xf32>
    %23 = tpu.concatenate %21, %22 in 1 : vector<4x253xf32>, vector<4x3xf32> -> vector<4x256xf32>
    %cst_4 = arith.constant 0.000000e+00 : f32
    %24 = vector.broadcast %cst_4 : f32 to vector<4x256xf32>
    %cst_5 = arith.constant 0.000000e+00 : f32
    %25 = vector.broadcast %cst_5 : f32 to vector<4x256xf32>
    %c0_6 = arith.constant 0 : index
    %c0_7 = arith.constant 0 : index
    %c0_8 = arith.constant 0 : index
    %26 = vector.load %arg1[%c0_6, %c0_7, %c0_8] : memref<49x4x256xf32, #tpu.memory_space<vmem>>, vector<1x4x256xf32>
    %27 = vector.shape_cast %26 : vector<1x4x256xf32> to vector<4x256xf32>
    %28 = arith.mulf %27, %8 : vector<4x256xf32>
    %29 = arith.addf %25, %28 : vector<4x256xf32>
    %c1 = arith.constant 1 : index
    %c0_9 = arith.constant 0 : index
    %c0_10 = arith.constant 0 : index
    %30 = vector.load %arg1[%c1, %c0_9, %c0_10] : memref<49x4x256xf32, #tpu.memory_space<vmem>>, vector<1x4x256xf32>
    %31 = vector.shape_cast %30 : vector<1x4x256xf32> to vector<4x256xf32>
    %32 = arith.mulf %31, %11 : vector<4x256xf32>
    %33 = arith.addf %29, %32 : vector<4x256xf32>
    %c2 = arith.constant 2 : index
    %c0_11 = arith.constant 0 : index
    %c0_12 = arith.constant 0 : index
    %34 = vector.load %arg1[%c2, %c0_11, %c0_12] : memref<49x4x256xf32, #tpu.memory_space<vmem>>, vector<1x4x256xf32>
    %35 = vector.shape_cast %34 : vector<1x4x256xf32> to vector<4x256xf32>
    %36 = arith.mulf %35, %14 : vector<4x256xf32>
    %37 = arith.addf %33, %36 : vector<4x256xf32>
    %c3 = arith.constant 3 : index
    %c0_13 = arith.constant 0 : index
    %c0_14 = arith.constant 0 : index
    %38 = vector.load %arg1[%c3, %c0_13, %c0_14] : memref<49x4x256xf32, #tpu.memory_space<vmem>>, vector<1x4x256xf32>
    %39 = vector.shape_cast %38 : vector<1x4x256xf32> to vector<4x256xf32>
    %40 = arith.mulf %39, %5 : vector<4x256xf32>
    %41 = arith.addf %37, %40 : vector<4x256xf32>
    %c4 = arith.constant 4 : index
    %c0_15 = arith.constant 0 : index
    %c0_16 = arith.constant 0 : index
    %42 = vector.load %arg1[%c4, %c0_15, %c0_16] : memref<49x4x256xf32, #tpu.memory_space<vmem>>, vector<1x4x256xf32>
    %43 = vector.shape_cast %42 : vector<1x4x256xf32> to vector<4x256xf32>
    %44 = arith.mulf %43, %17 : vector<4x256xf32>
    %45 = arith.addf %41, %44 : vector<4x256xf32>
    %c5 = arith.constant 5 : index
    %c0_17 = arith.constant 0 : index
    %c0_18 = arith.constant 0 : index
    %46 = vector.load %arg1[%c5, %c0_17, %c0_18] : memref<49x4x256xf32, #tpu.memory_space<vmem>>, vector<1x4x256xf32>
    %47 = vector.shape_cast %46 : vector<1x4x256xf32> to vector<4x256xf32>
    %48 = arith.mulf %47, %20 : vector<4x256xf32>
    %49 = arith.addf %45, %48 : vector<4x256xf32>
    %c6 = arith.constant 6 : index
    %c0_19 = arith.constant 0 : index
    %c0_20 = arith.constant 0 : index
    %50 = vector.load %arg1[%c6, %c0_19, %c0_20] : memref<49x4x256xf32, #tpu.memory_space<vmem>>, vector<1x4x256xf32>
    %51 = vector.shape_cast %50 : vector<1x4x256xf32> to vector<4x256xf32>
    %52 = arith.mulf %51, %23 : vector<4x256xf32>
    %53 = arith.addf %49, %52 : vector<4x256xf32>
    %54 = vector.extract_strided_slice %53 {offsets = [0, 208], sizes = [4, 48], strides = [1, 1]} : vector<4x256xf32> to vector<4x48xf32>
    %55 = vector.extract_strided_slice %53 {offsets = [0, 0], sizes = [4, 208], strides = [1, 1]} : vector<4x256xf32> to vector<4x208xf32>
    %56 = tpu.concatenate %54, %55 in 1 : vector<4x48xf32>, vector<4x208xf32> -> vector<4x256xf32>
    %57 = arith.addf %24, %56 : vector<4x256xf32>
    %cst_21 = arith.constant 0.000000e+00 : f32
    %58 = vector.broadcast %cst_21 : f32 to vector<4x256xf32>
    %c7 = arith.constant 7 : index
    %c0_22 = arith.constant 0 : index
    %c0_23 = arith.constant 0 : index
    %59 = vector.load %arg1[%c7, %c0_22, %c0_23] : memref<49x4x256xf32, #tpu.memory_space<vmem>>, vector<1x4x256xf32>
    %60 = vector.shape_cast %59 : vector<1x4x256xf32> to vector<4x256xf32>
    %61 = arith.mulf %60, %8 : vector<4x256xf32>
    %62 = arith.addf %58, %61 : vector<4x256xf32>
    %c8 = arith.constant 8 : index
    %c0_24 = arith.constant 0 : index
    %c0_25 = arith.constant 0 : index
    %63 = vector.load %arg1[%c8, %c0_24, %c0_25] : memref<49x4x256xf32, #tpu.memory_space<vmem>>, vector<1x4x256xf32>
    %64 = vector.shape_cast %63 : vector<1x4x256xf32> to vector<4x256xf32>
    %65 = arith.mulf %64, %11 : vector<4x256xf32>
    %66 = arith.addf %62, %65 : vector<4x256xf32>
    %c9 = arith.constant 9 : index
    %c0_26 = arith.constant 0 : index
    %c0_27 = arith.constant 0 : index
    %67 = vector.load %arg1[%c9, %c0_26, %c0_27] : memref<49x4x256xf32, #tpu.memory_space<vmem>>, vector<1x4x256xf32>
    %68 = vector.shape_cast %67 : vector<1x4x256xf32> to vector<4x256xf32>
    %69 = arith.mulf %68, %14 : vector<4x256xf32>
    %70 = arith.addf %66, %69 : vector<4x256xf32>
    %c10 = arith.constant 10 : index
    %c0_28 = arith.constant 0 : index
    %c0_29 = arith.constant 0 : index
    %71 = vector.load %arg1[%c10, %c0_28, %c0_29] : memref<49x4x256xf32, #tpu.memory_space<vmem>>, vector<1x4x256xf32>
    %72 = vector.shape_cast %71 : vector<1x4x256xf32> to vector<4x256xf32>
    %73 = arith.mulf %72, %5 : vector<4x256xf32>
    %74 = arith.addf %70, %73 : vector<4x256xf32>
    %c11 = arith.constant 11 : index
    %c0_30 = arith.constant 0 : index
    %c0_31 = arith.constant 0 : index
    %75 = vector.load %arg1[%c11, %c0_30, %c0_31] : memref<49x4x256xf32, #tpu.memory_space<vmem>>, vector<1x4x256xf32>
    %76 = vector.shape_cast %75 : vector<1x4x256xf32> to vector<4x256xf32>
    %77 = arith.mulf %76, %17 : vector<4x256xf32>
    %78 = arith.addf %74, %77 : vector<4x256xf32>
    %c12 = arith.constant 12 : index
    %c0_32 = arith.constant 0 : index
    %c0_33 = arith.constant 0 : index
    %79 = vector.load %arg1[%c12, %c0_32, %c0_33] : memref<49x4x256xf32, #tpu.memory_space<vmem>>, vector<1x4x256xf32>
    %80 = vector.shape_cast %79 : vector<1x4x256xf32> to vector<4x256xf32>
    %81 = arith.mulf %80, %20 : vector<4x256xf32>
    %82 = arith.addf %78, %81 : vector<4x256xf32>
    %c13 = arith.constant 13 : index
    %c0_34 = arith.constant 0 : index
    %c0_35 = arith.constant 0 : index
    %83 = vector.load %arg1[%c13, %c0_34, %c0_35] : memref<49x4x256xf32, #tpu.memory_space<vmem>>, vector<1x4x256xf32>
    %84 = vector.shape_cast %83 : vector<1x4x256xf32> to vector<4x256xf32>
    %85 = arith.mulf %84, %23 : vector<4x256xf32>
    %86 = arith.addf %82, %85 : vector<4x256xf32>
    %87 = vector.extract_strided_slice %86 {offsets = [0, 224], sizes = [4, 32], strides = [1, 1]} : vector<4x256xf32> to vector<4x32xf32>
    %88 = vector.extract_strided_slice %86 {offsets = [0, 0], sizes = [4, 224], strides = [1, 1]} : vector<4x256xf32> to vector<4x224xf32>
    %89 = tpu.concatenate %87, %88 in 1 : vector<4x32xf32>, vector<4x224xf32> -> vector<4x256xf32>
    %90 = arith.addf %57, %89 : vector<4x256xf32>
    %cst_36 = arith.constant 0.000000e+00 : f32
    %91 = vector.broadcast %cst_36 : f32 to vector<4x256xf32>
    %c14 = arith.constant 14 : index
    %c0_37 = arith.constant 0 : index
    %c0_38 = arith.constant 0 : index
    %92 = vector.load %arg1[%c14, %c0_37, %c0_38] : memref<49x4x256xf32, #tpu.memory_space<vmem>>, vector<1x4x256xf32>
    %93 = vector.shape_cast %92 : vector<1x4x256xf32> to vector<4x256xf32>
    %94 = arith.mulf %93, %8 : vector<4x256xf32>
    %95 = arith.addf %91, %94 : vector<4x256xf32>
    %c15 = arith.constant 15 : index
    %c0_39 = arith.constant 0 : index
    %c0_40 = arith.constant 0 : index
    %96 = vector.load %arg1[%c15, %c0_39, %c0_40] : memref<49x4x256xf32, #tpu.memory_space<vmem>>, vector<1x4x256xf32>
    %97 = vector.shape_cast %96 : vector<1x4x256xf32> to vector<4x256xf32>
    %98 = arith.mulf %97, %11 : vector<4x256xf32>
    %99 = arith.addf %95, %98 : vector<4x256xf32>
    %c16 = arith.constant 16 : index
    %c0_41 = arith.constant 0 : index
    %c0_42 = arith.constant 0 : index
    %100 = vector.load %arg1[%c16, %c0_41, %c0_42] : memref<49x4x256xf32, #tpu.memory_space<vmem>>, vector<1x4x256xf32>
    %101 = vector.shape_cast %100 : vector<1x4x256xf32> to vector<4x256xf32>
    %102 = arith.mulf %101, %14 : vector<4x256xf32>
    %103 = arith.addf %99, %102 : vector<4x256xf32>
    %c17 = arith.constant 17 : index
    %c0_43 = arith.constant 0 : index
    %c0_44 = arith.constant 0 : index
    %104 = vector.load %arg1[%c17, %c0_43, %c0_44] : memref<49x4x256xf32, #tpu.memory_space<vmem>>, vector<1x4x256xf32>
    %105 = vector.shape_cast %104 : vector<1x4x256xf32> to vector<4x256xf32>
    %106 = arith.mulf %105, %5 : vector<4x256xf32>
    %107 = arith.addf %103, %106 : vector<4x256xf32>
    %c18 = arith.constant 18 : index
    %c0_45 = arith.constant 0 : index
    %c0_46 = arith.constant 0 : index
    %108 = vector.load %arg1[%c18, %c0_45, %c0_46] : memref<49x4x256xf32, #tpu.memory_space<vmem>>, vector<1x4x256xf32>
    %109 = vector.shape_cast %108 : vector<1x4x256xf32> to vector<4x256xf32>
    %110 = arith.mulf %109, %17 : vector<4x256xf32>
    %111 = arith.addf %107, %110 : vector<4x256xf32>
    %c19 = arith.constant 19 : index
    %c0_47 = arith.constant 0 : index
    %c0_48 = arith.constant 0 : index
    %112 = vector.load %arg1[%c19, %c0_47, %c0_48] : memref<49x4x256xf32, #tpu.memory_space<vmem>>, vector<1x4x256xf32>
    %113 = vector.shape_cast %112 : vector<1x4x256xf32> to vector<4x256xf32>
    %114 = arith.mulf %113, %20 : vector<4x256xf32>
    %115 = arith.addf %111, %114 : vector<4x256xf32>
    %c20 = arith.constant 20 : index
    %c0_49 = arith.constant 0 : index
    %c0_50 = arith.constant 0 : index
    %116 = vector.load %arg1[%c20, %c0_49, %c0_50] : memref<49x4x256xf32, #tpu.memory_space<vmem>>, vector<1x4x256xf32>
    %117 = vector.shape_cast %116 : vector<1x4x256xf32> to vector<4x256xf32>
    %118 = arith.mulf %117, %23 : vector<4x256xf32>
    %119 = arith.addf %115, %118 : vector<4x256xf32>
    %120 = vector.extract_strided_slice %119 {offsets = [0, 240], sizes = [4, 16], strides = [1, 1]} : vector<4x256xf32> to vector<4x16xf32>
    %121 = vector.extract_strided_slice %119 {offsets = [0, 0], sizes = [4, 240], strides = [1, 1]} : vector<4x256xf32> to vector<4x240xf32>
    %122 = tpu.concatenate %120, %121 in 1 : vector<4x16xf32>, vector<4x240xf32> -> vector<4x256xf32>
    %123 = arith.addf %90, %122 : vector<4x256xf32>
    %cst_51 = arith.constant 0.000000e+00 : f32
    %124 = vector.broadcast %cst_51 : f32 to vector<4x256xf32>
    %c21 = arith.constant 21 : index
    %c0_52 = arith.constant 0 : index
    %c0_53 = arith.constant 0 : index
    %125 = vector.load %arg1[%c21, %c0_52, %c0_53] : memref<49x4x256xf32, #tpu.memory_space<vmem>>, vector<1x4x256xf32>
    %126 = vector.shape_cast %125 : vector<1x4x256xf32> to vector<4x256xf32>
    %127 = arith.mulf %126, %8 : vector<4x256xf32>
    %128 = arith.addf %124, %127 : vector<4x256xf32>
    %c22 = arith.constant 22 : index
    %c0_54 = arith.constant 0 : index
    %c0_55 = arith.constant 0 : index
    %129 = vector.load %arg1[%c22, %c0_54, %c0_55] : memref<49x4x256xf32, #tpu.memory_space<vmem>>, vector<1x4x256xf32>
    %130 = vector.shape_cast %129 : vector<1x4x256xf32> to vector<4x256xf32>
    %131 = arith.mulf %130, %11 : vector<4x256xf32>
    %132 = arith.addf %128, %131 : vector<4x256xf32>
    %c23 = arith.constant 23 : index
    %c0_56 = arith.constant 0 : index
    %c0_57 = arith.constant 0 : index
    %133 = vector.load %arg1[%c23, %c0_56, %c0_57] : memref<49x4x256xf32, #tpu.memory_space<vmem>>, vector<1x4x256xf32>
    %134 = vector.shape_cast %133 : vector<1x4x256xf32> to vector<4x256xf32>
    %135 = arith.mulf %134, %14 : vector<4x256xf32>
    %136 = arith.addf %132, %135 : vector<4x256xf32>
    %c24 = arith.constant 24 : index
    %c0_58 = arith.constant 0 : index
    %c0_59 = arith.constant 0 : index
    %137 = vector.load %arg1[%c24, %c0_58, %c0_59] : memref<49x4x256xf32, #tpu.memory_space<vmem>>, vector<1x4x256xf32>
    %138 = vector.shape_cast %137 : vector<1x4x256xf32> to vector<4x256xf32>
    %139 = arith.mulf %138, %5 : vector<4x256xf32>
    %140 = arith.addf %136, %139 : vector<4x256xf32>
    %c25 = arith.constant 25 : index
    %c0_60 = arith.constant 0 : index
    %c0_61 = arith.constant 0 : index
    %141 = vector.load %arg1[%c25, %c0_60, %c0_61] : memref<49x4x256xf32, #tpu.memory_space<vmem>>, vector<1x4x256xf32>
    %142 = vector.shape_cast %141 : vector<1x4x256xf32> to vector<4x256xf32>
    %143 = arith.mulf %142, %17 : vector<4x256xf32>
    %144 = arith.addf %140, %143 : vector<4x256xf32>
    %c26 = arith.constant 26 : index
    %c0_62 = arith.constant 0 : index
    %c0_63 = arith.constant 0 : index
    %145 = vector.load %arg1[%c26, %c0_62, %c0_63] : memref<49x4x256xf32, #tpu.memory_space<vmem>>, vector<1x4x256xf32>
    %146 = vector.shape_cast %145 : vector<1x4x256xf32> to vector<4x256xf32>
    %147 = arith.mulf %146, %20 : vector<4x256xf32>
    %148 = arith.addf %144, %147 : vector<4x256xf32>
    %c27 = arith.constant 27 : index
    %c0_64 = arith.constant 0 : index
    %c0_65 = arith.constant 0 : index
    %149 = vector.load %arg1[%c27, %c0_64, %c0_65] : memref<49x4x256xf32, #tpu.memory_space<vmem>>, vector<1x4x256xf32>
    %150 = vector.shape_cast %149 : vector<1x4x256xf32> to vector<4x256xf32>
    %151 = arith.mulf %150, %23 : vector<4x256xf32>
    %152 = arith.addf %148, %151 : vector<4x256xf32>
    %153 = arith.addf %123, %152 : vector<4x256xf32>
    %cst_66 = arith.constant 0.000000e+00 : f32
    %154 = vector.broadcast %cst_66 : f32 to vector<4x256xf32>
    %c28 = arith.constant 28 : index
    %c0_67 = arith.constant 0 : index
    %c0_68 = arith.constant 0 : index
    %155 = vector.load %arg1[%c28, %c0_67, %c0_68] : memref<49x4x256xf32, #tpu.memory_space<vmem>>, vector<1x4x256xf32>
    %156 = vector.shape_cast %155 : vector<1x4x256xf32> to vector<4x256xf32>
    %157 = arith.mulf %156, %8 : vector<4x256xf32>
    %158 = arith.addf %154, %157 : vector<4x256xf32>
    %c29 = arith.constant 29 : index
    %c0_69 = arith.constant 0 : index
    %c0_70 = arith.constant 0 : index
    %159 = vector.load %arg1[%c29, %c0_69, %c0_70] : memref<49x4x256xf32, #tpu.memory_space<vmem>>, vector<1x4x256xf32>
    %160 = vector.shape_cast %159 : vector<1x4x256xf32> to vector<4x256xf32>
    %161 = arith.mulf %160, %11 : vector<4x256xf32>
    %162 = arith.addf %158, %161 : vector<4x256xf32>
    %c30 = arith.constant 30 : index
    %c0_71 = arith.constant 0 : index
    %c0_72 = arith.constant 0 : index
    %163 = vector.load %arg1[%c30, %c0_71, %c0_72] : memref<49x4x256xf32, #tpu.memory_space<vmem>>, vector<1x4x256xf32>
    %164 = vector.shape_cast %163 : vector<1x4x256xf32> to vector<4x256xf32>
    %165 = arith.mulf %164, %14 : vector<4x256xf32>
    %166 = arith.addf %162, %165 : vector<4x256xf32>
    %c31 = arith.constant 31 : index
    %c0_73 = arith.constant 0 : index
    %c0_74 = arith.constant 0 : index
    %167 = vector.load %arg1[%c31, %c0_73, %c0_74] : memref<49x4x256xf32, #tpu.memory_space<vmem>>, vector<1x4x256xf32>
    %168 = vector.shape_cast %167 : vector<1x4x256xf32> to vector<4x256xf32>
    %169 = arith.mulf %168, %5 : vector<4x256xf32>
    %170 = arith.addf %166, %169 : vector<4x256xf32>
    %c32 = arith.constant 32 : index
    %c0_75 = arith.constant 0 : index
    %c0_76 = arith.constant 0 : index
    %171 = vector.load %arg1[%c32, %c0_75, %c0_76] : memref<49x4x256xf32, #tpu.memory_space<vmem>>, vector<1x4x256xf32>
    %172 = vector.shape_cast %171 : vector<1x4x256xf32> to vector<4x256xf32>
    %173 = arith.mulf %172, %17 : vector<4x256xf32>
    %174 = arith.addf %170, %173 : vector<4x256xf32>
    %c33 = arith.constant 33 : index
    %c0_77 = arith.constant 0 : index
    %c0_78 = arith.constant 0 : index
    %175 = vector.load %arg1[%c33, %c0_77, %c0_78] : memref<49x4x256xf32, #tpu.memory_space<vmem>>, vector<1x4x256xf32>
    %176 = vector.shape_cast %175 : vector<1x4x256xf32> to vector<4x256xf32>
    %177 = arith.mulf %176, %20 : vector<4x256xf32>
    %178 = arith.addf %174, %177 : vector<4x256xf32>
    %c34 = arith.constant 34 : index
    %c0_79 = arith.constant 0 : index
    %c0_80 = arith.constant 0 : index
    %179 = vector.load %arg1[%c34, %c0_79, %c0_80] : memref<49x4x256xf32, #tpu.memory_space<vmem>>, vector<1x4x256xf32>
    %180 = vector.shape_cast %179 : vector<1x4x256xf32> to vector<4x256xf32>
    %181 = arith.mulf %180, %23 : vector<4x256xf32>
    %182 = arith.addf %178, %181 : vector<4x256xf32>
    %183 = vector.extract_strided_slice %182 {offsets = [0, 16], sizes = [4, 240], strides = [1, 1]} : vector<4x256xf32> to vector<4x240xf32>
    %184 = vector.extract_strided_slice %182 {offsets = [0, 0], sizes = [4, 16], strides = [1, 1]} : vector<4x256xf32> to vector<4x16xf32>
    %185 = tpu.concatenate %183, %184 in 1 : vector<4x240xf32>, vector<4x16xf32> -> vector<4x256xf32>
    %186 = arith.addf %153, %185 : vector<4x256xf32>
    %cst_81 = arith.constant 0.000000e+00 : f32
    %187 = vector.broadcast %cst_81 : f32 to vector<4x256xf32>
    %c35 = arith.constant 35 : index
    %c0_82 = arith.constant 0 : index
    %c0_83 = arith.constant 0 : index
    %188 = vector.load %arg1[%c35, %c0_82, %c0_83] : memref<49x4x256xf32, #tpu.memory_space<vmem>>, vector<1x4x256xf32>
    %189 = vector.shape_cast %188 : vector<1x4x256xf32> to vector<4x256xf32>
    %190 = arith.mulf %189, %8 : vector<4x256xf32>
    %191 = arith.addf %187, %190 : vector<4x256xf32>
    %c36 = arith.constant 36 : index
    %c0_84 = arith.constant 0 : index
    %c0_85 = arith.constant 0 : index
    %192 = vector.load %arg1[%c36, %c0_84, %c0_85] : memref<49x4x256xf32, #tpu.memory_space<vmem>>, vector<1x4x256xf32>
    %193 = vector.shape_cast %192 : vector<1x4x256xf32> to vector<4x256xf32>
    %194 = arith.mulf %193, %11 : vector<4x256xf32>
    %195 = arith.addf %191, %194 : vector<4x256xf32>
    %c37 = arith.constant 37 : index
    %c0_86 = arith.constant 0 : index
    %c0_87 = arith.constant 0 : index
    %196 = vector.load %arg1[%c37, %c0_86, %c0_87] : memref<49x4x256xf32, #tpu.memory_space<vmem>>, vector<1x4x256xf32>
    %197 = vector.shape_cast %196 : vector<1x4x256xf32> to vector<4x256xf32>
    %198 = arith.mulf %197, %14 : vector<4x256xf32>
    %199 = arith.addf %195, %198 : vector<4x256xf32>
    %c38 = arith.constant 38 : index
    %c0_88 = arith.constant 0 : index
    %c0_89 = arith.constant 0 : index
    %200 = vector.load %arg1[%c38, %c0_88, %c0_89] : memref<49x4x256xf32, #tpu.memory_space<vmem>>, vector<1x4x256xf32>
    %201 = vector.shape_cast %200 : vector<1x4x256xf32> to vector<4x256xf32>
    %202 = arith.mulf %201, %5 : vector<4x256xf32>
    %203 = arith.addf %199, %202 : vector<4x256xf32>
    %c39 = arith.constant 39 : index
    %c0_90 = arith.constant 0 : index
    %c0_91 = arith.constant 0 : index
    %204 = vector.load %arg1[%c39, %c0_90, %c0_91] : memref<49x4x256xf32, #tpu.memory_space<vmem>>, vector<1x4x256xf32>
    %205 = vector.shape_cast %204 : vector<1x4x256xf32> to vector<4x256xf32>
    %206 = arith.mulf %205, %17 : vector<4x256xf32>
    %207 = arith.addf %203, %206 : vector<4x256xf32>
    %c40 = arith.constant 40 : index
    %c0_92 = arith.constant 0 : index
    %c0_93 = arith.constant 0 : index
    %208 = vector.load %arg1[%c40, %c0_92, %c0_93] : memref<49x4x256xf32, #tpu.memory_space<vmem>>, vector<1x4x256xf32>
    %209 = vector.shape_cast %208 : vector<1x4x256xf32> to vector<4x256xf32>
    %210 = arith.mulf %209, %20 : vector<4x256xf32>
    %211 = arith.addf %207, %210 : vector<4x256xf32>
    %c41 = arith.constant 41 : index
    %c0_94 = arith.constant 0 : index
    %c0_95 = arith.constant 0 : index
    %212 = vector.load %arg1[%c41, %c0_94, %c0_95] : memref<49x4x256xf32, #tpu.memory_space<vmem>>, vector<1x4x256xf32>
    %213 = vector.shape_cast %212 : vector<1x4x256xf32> to vector<4x256xf32>
    %214 = arith.mulf %213, %23 : vector<4x256xf32>
    %215 = arith.addf %211, %214 : vector<4x256xf32>
    %216 = vector.extract_strided_slice %215 {offsets = [0, 32], sizes = [4, 224], strides = [1, 1]} : vector<4x256xf32> to vector<4x224xf32>
    %217 = vector.extract_strided_slice %215 {offsets = [0, 0], sizes = [4, 32], strides = [1, 1]} : vector<4x256xf32> to vector<4x32xf32>
    %218 = tpu.concatenate %216, %217 in 1 : vector<4x224xf32>, vector<4x32xf32> -> vector<4x256xf32>
    %219 = arith.addf %186, %218 : vector<4x256xf32>
    %cst_96 = arith.constant 0.000000e+00 : f32
    %220 = vector.broadcast %cst_96 : f32 to vector<4x256xf32>
    %c42 = arith.constant 42 : index
    %c0_97 = arith.constant 0 : index
    %c0_98 = arith.constant 0 : index
    %221 = vector.load %arg1[%c42, %c0_97, %c0_98] : memref<49x4x256xf32, #tpu.memory_space<vmem>>, vector<1x4x256xf32>
    %222 = vector.shape_cast %221 : vector<1x4x256xf32> to vector<4x256xf32>
    %223 = arith.mulf %222, %8 : vector<4x256xf32>
    %224 = arith.addf %220, %223 : vector<4x256xf32>
    %c43 = arith.constant 43 : index
    %c0_99 = arith.constant 0 : index
    %c0_100 = arith.constant 0 : index
    %225 = vector.load %arg1[%c43, %c0_99, %c0_100] : memref<49x4x256xf32, #tpu.memory_space<vmem>>, vector<1x4x256xf32>
    %226 = vector.shape_cast %225 : vector<1x4x256xf32> to vector<4x256xf32>
    %227 = arith.mulf %226, %11 : vector<4x256xf32>
    %228 = arith.addf %224, %227 : vector<4x256xf32>
    %c44 = arith.constant 44 : index
    %c0_101 = arith.constant 0 : index
    %c0_102 = arith.constant 0 : index
    %229 = vector.load %arg1[%c44, %c0_101, %c0_102] : memref<49x4x256xf32, #tpu.memory_space<vmem>>, vector<1x4x256xf32>
    %230 = vector.shape_cast %229 : vector<1x4x256xf32> to vector<4x256xf32>
    %231 = arith.mulf %230, %14 : vector<4x256xf32>
    %232 = arith.addf %228, %231 : vector<4x256xf32>
    %c45 = arith.constant 45 : index
    %c0_103 = arith.constant 0 : index
    %c0_104 = arith.constant 0 : index
    %233 = vector.load %arg1[%c45, %c0_103, %c0_104] : memref<49x4x256xf32, #tpu.memory_space<vmem>>, vector<1x4x256xf32>
    %234 = vector.shape_cast %233 : vector<1x4x256xf32> to vector<4x256xf32>
    %235 = arith.mulf %234, %5 : vector<4x256xf32>
    %236 = arith.addf %232, %235 : vector<4x256xf32>
    %c46 = arith.constant 46 : index
    %c0_105 = arith.constant 0 : index
    %c0_106 = arith.constant 0 : index
    %237 = vector.load %arg1[%c46, %c0_105, %c0_106] : memref<49x4x256xf32, #tpu.memory_space<vmem>>, vector<1x4x256xf32>
    %238 = vector.shape_cast %237 : vector<1x4x256xf32> to vector<4x256xf32>
    %239 = arith.mulf %238, %17 : vector<4x256xf32>
    %240 = arith.addf %236, %239 : vector<4x256xf32>
    %c47 = arith.constant 47 : index
    %c0_107 = arith.constant 0 : index
    %c0_108 = arith.constant 0 : index
    %241 = vector.load %arg1[%c47, %c0_107, %c0_108] : memref<49x4x256xf32, #tpu.memory_space<vmem>>, vector<1x4x256xf32>
    %242 = vector.shape_cast %241 : vector<1x4x256xf32> to vector<4x256xf32>
    %243 = arith.mulf %242, %20 : vector<4x256xf32>
    %244 = arith.addf %240, %243 : vector<4x256xf32>
    %c48 = arith.constant 48 : index
    %c0_109 = arith.constant 0 : index
    %c0_110 = arith.constant 0 : index
    %245 = vector.load %arg1[%c48, %c0_109, %c0_110] : memref<49x4x256xf32, #tpu.memory_space<vmem>>, vector<1x4x256xf32>
    %246 = vector.shape_cast %245 : vector<1x4x256xf32> to vector<4x256xf32>
    %247 = arith.mulf %246, %23 : vector<4x256xf32>
    %248 = arith.addf %244, %247 : vector<4x256xf32>
    %249 = vector.extract_strided_slice %248 {offsets = [0, 48], sizes = [4, 208], strides = [1, 1]} : vector<4x256xf32> to vector<4x208xf32>
    %250 = vector.extract_strided_slice %248 {offsets = [0, 0], sizes = [4, 48], strides = [1, 1]} : vector<4x256xf32> to vector<4x48xf32>
    %251 = tpu.concatenate %249, %250 in 1 : vector<4x208xf32>, vector<4x48xf32> -> vector<4x256xf32>
    %252 = arith.addf %219, %251 : vector<4x256xf32>
    %253 = vector.extract_strided_slice %252 {offsets = [0, 0], sizes = [2, 256], strides = [1, 1]} : vector<4x256xf32> to vector<2x256xf32>
    %254 = vector.extract_strided_slice %252 {offsets = [2, 0], sizes = [2, 256], strides = [1, 1]} : vector<4x256xf32> to vector<2x256xf32>
    %255 = arith.addf %253, %254 : vector<2x256xf32>
    %256 = arith.negf %255 : vector<2x256xf32>
    %257 = math.exp %256 : vector<2x256xf32>
    %cst_111 = arith.constant 1.000000e+00 : f32
    %258 = vector.broadcast %cst_111 : f32 to vector<2x256xf32>
    %259 = arith.addf %258, %257 : vector<2x256xf32>
    %260 = arith.divf %258, %259 : vector<2x256xf32>
    %261 = vector.shape_cast %260 : vector<2x256xf32> to vector<2x1x256xf32>
    %262 = vector.broadcast %261 : vector<2x1x256xf32> to vector<2x16x256xf32>
    %263 = arith.mulf %0, %262 : vector<2x16x256xf32>
    %cst_112 = arith.constant dense<0.000000e+00> : vector<2x16xf32>
    %264 = vector.multi_reduction <add>, %263, %cst_112 [2] : vector<2x16x256xf32> to vector<2x16xf32>
    %265 = vector.shape_cast %264 : vector<2x16xf32> to vector<2x16x1xf32>
    %cst_113 = arith.constant 2.560000e+02 : f32
    %266 = vector.broadcast %cst_113 : f32 to vector<2x16x1xf32>
    %267 = arith.divf %265, %266 : vector<2x16x1xf32>
    %cst_114 = arith.constant dense<0xFF800000> : vector<2x16xf32>
    %268 = vector.multi_reduction <maximumf>, %263, %cst_114 [2] : vector<2x16x256xf32> to vector<2x16xf32>
    %269 = vector.shape_cast %268 : vector<2x16xf32> to vector<2x16x1xf32>
    %270 = tpu.concatenate %267, %269 in 0 : vector<2x16x1xf32>, vector<2x16x1xf32> -> vector<4x16x1xf32>
    %c0_115 = arith.constant 0 : index
    %c0_116 = arith.constant 0 : index
    %271 = vector.load %arg2[%c0_115, %c0_116] : memref<16x2xf32, #tpu.memory_space<vmem>>, vector<16x2xf32>
    %c0_117 = arith.constant 0 : index
    %c0_118 = arith.constant 0 : index
    %272 = vector.load %arg3[%c0_117, %c0_118] : memref<16x2xf32, #tpu.memory_space<vmem>>, vector<16x2xf32>
    %cst_119 = arith.constant 0.000000e+00 : f32
    %273 = vector.broadcast %cst_119 : f32 to vector<4x16x1xf32>
    %274 = vector.extract_strided_slice %271 {offsets = [0, 0], sizes = [16, 1], strides = [1, 1]} : vector<16x2xf32> to vector<16x1xf32>
    %275 = vector.shape_cast %274 : vector<16x1xf32> to vector<1x16x1xf32>
    %276 = vector.broadcast %275 : vector<1x16x1xf32> to vector<4x16x1xf32>
    %277 = arith.mulf %270, %276 : vector<4x16x1xf32>
    %cst_120 = arith.constant dense<0.000000e+00> : vector<4x1xf32>
    %278 = vector.multi_reduction <add>, %277, %cst_120 [1] : vector<4x16x1xf32> to vector<4x1xf32>
    %279 = vector.shape_cast %278 : vector<4x1xf32> to vector<4x1x1xf32>
    %cst_121 = arith.constant 0.000000e+00 : f32
    %280 = vector.broadcast %cst_121 : f32 to vector<4x1x1xf32>
    %281 = arith.maximumf %279, %280 : vector<4x1x1xf32>
    %282 = vector.extract_strided_slice %272 {offsets = [0, 0], sizes = [16, 1], strides = [1, 1]} : vector<16x2xf32> to vector<16x1xf32>
    %283 = vector.shape_cast %282 : vector<16x1xf32> to vector<1x16x1xf32>
    %284 = vector.broadcast %281 : vector<4x1x1xf32> to vector<4x16x1xf32>
    %285 = vector.broadcast %283 : vector<1x16x1xf32> to vector<4x16x1xf32>
    %286 = arith.mulf %284, %285 : vector<4x16x1xf32>
    %287 = arith.addf %273, %286 : vector<4x16x1xf32>
    %288 = vector.extract_strided_slice %271 {offsets = [0, 1], sizes = [16, 1], strides = [1, 1]} : vector<16x2xf32> to vector<16x1xf32>
    %289 = vector.shape_cast %288 : vector<16x1xf32> to vector<1x16x1xf32>
    %290 = vector.broadcast %289 : vector<1x16x1xf32> to vector<4x16x1xf32>
    %291 = arith.mulf %270, %290 : vector<4x16x1xf32>
    %cst_122 = arith.constant dense<0.000000e+00> : vector<4x1xf32>
    %292 = vector.multi_reduction <add>, %291, %cst_122 [1] : vector<4x16x1xf32> to vector<4x1xf32>
    %293 = vector.shape_cast %292 : vector<4x1xf32> to vector<4x1x1xf32>
    %cst_123 = arith.constant 0.000000e+00 : f32
    %294 = vector.broadcast %cst_123 : f32 to vector<4x1x1xf32>
    %295 = arith.maximumf %293, %294 : vector<4x1x1xf32>
    %296 = vector.extract_strided_slice %272 {offsets = [0, 1], sizes = [16, 1], strides = [1, 1]} : vector<16x2xf32> to vector<16x1xf32>
    %297 = vector.shape_cast %296 : vector<16x1xf32> to vector<1x16x1xf32>
    %298 = vector.broadcast %295 : vector<4x1x1xf32> to vector<4x16x1xf32>
    %299 = vector.broadcast %297 : vector<1x16x1xf32> to vector<4x16x1xf32>
    %300 = arith.mulf %298, %299 : vector<4x16x1xf32>
    %301 = arith.addf %287, %300 : vector<4x16x1xf32>
    %302 = vector.extract_strided_slice %301 {offsets = [0, 0, 0], sizes = [2, 16, 1], strides = [1, 1, 1]} : vector<4x16x1xf32> to vector<2x16x1xf32>
    %303 = vector.extract_strided_slice %301 {offsets = [2, 0, 0], sizes = [2, 16, 1], strides = [1, 1, 1]} : vector<4x16x1xf32> to vector<2x16x1xf32>
    %304 = arith.addf %302, %303 : vector<2x16x1xf32>
    %305 = arith.negf %304 : vector<2x16x1xf32>
    %306 = math.exp %305 : vector<2x16x1xf32>
    %cst_124 = arith.constant 1.000000e+00 : f32
    %307 = vector.broadcast %cst_124 : f32 to vector<2x16x1xf32>
    %308 = arith.addf %307, %306 : vector<2x16x1xf32>
    %309 = arith.divf %307, %308 : vector<2x16x1xf32>
    %310 = vector.broadcast %309 : vector<2x16x1xf32> to vector<2x16x256xf32>
    %311 = arith.mulf %263, %310 : vector<2x16x256xf32>
    %c0_125 = arith.constant 0 : index
    %c0_126 = arith.constant 0 : index
    %c0_127 = arith.constant 0 : index
    %312 = vector.load %arg4[%c0_125, %c0_126, %c0_127] : memref<2x16x256xf32, #tpu.memory_space<vmem>>, vector<2x16x256xf32>
    tpu.vector_store %arg4[%c0_125, %c0_126, %c0_127], %311 {strides = array<i32>} : memref<2x16x256xf32, #tpu.memory_space<vmem>>, vector<2x16x256xf32>,
    return
  }
}

</mosaic_0001>

<bundles_post_ra>
// kernel: cbam_sc_block.1
= control target key start
LH: loop header
LB: loop body
LE: loop exit
PB: predicated region body
PF: predicated region fallthrough
CT: control target
= control target key end

     0   :  { %vm99_vm0 = vcmask 1043459   ;;  %vm90_vm1 = vcmask 1041409   ;;  %vm104_vm2 = vcmask 1041408   ;;  %s880_s5 = smov 3   ;;  %s881_s6 = smov 1   ;;  %vm123_vm3 = vcmask 15360   ;;  %s1326_s0 = inlined_call_operand.vmem [shape: f32[2,16,256], index: 0, kind: input, shape index: {}]   ;;  %s1327_s1 = inlined_call_operand.vmem [shape: f32[49,4,256], index: 1, kind: input, shape index: {}]   ;;  %s1328_s2 = inlined_call_operand.vmem [shape: f32[16,2], index: 2, kind: input, shape index: {}]   ;;  %s1329_s3 = inlined_call_operand.vmem [shape: f32[16,2], index: 3, kind: input, shape index: {}]   ;;  %s1330_s4 = inlined_call_operand.vmem [shape: f32[2,16,256], index: 4, kind: output, shape index: {}]  }
   0x1   :  { %v921_v0 = vld [vmem:[%s1326_s0 + $0x8] sm:$0xff]  ;;  %v926_v1 = vld [vmem:[%s1326_s0 + $0x18] sm:$0xff]  ;;  %v945_v6 = vld [vmem:[%s1326_s0] sm:$0xff]  ;;  %s882_s7 = smov 127   ;;  %s883_s8 = smov 126   ;;  %vm114_vm4 = vcmask 23552  }
   0x2   :  { %v931_v2 = vld [vmem:[%s1326_s0 + $0x28] sm:$0xff]  ;;  %v936_v3 = vld [vmem:[%s1326_s0 + $0x38] sm:$0xff]  ;;  %v32_v4 = vadd.f32 %v926_v1, %v921_v0  ;;  %v65_v5 = vmax.f32 %v921_v0, %v926_v1  ;;  %v950_v7 = vld [vmem:[%s1326_s0 + $0x10] sm:$0xff]  ;;  %s884_s9 = smov 125   ;;  %vm132_vm5 = vcmask 7168   ;;  %vm140_vm6 = vcmask 1039360  }
   0x3   :  { %v46_v8 = vadd.f32 %v936_v3, %v931_v2  ;;  %v79_v9 = vmax.f32 %v931_v2, %v936_v3  ;;  %v959_v10 = vld [vmem:[%s1326_s0 + $0x20] sm:$0xff]  ;;  %v964_v11 = vld [vmem:[%s1326_s0 + $0x30] sm:$0xff]  ;;  %v25_v12 = vadd.f32 %v950_v7, %v945_v6  ;;  %v58_v13 = vmax.f32 %v945_v6, %v950_v7  ;;  %s879_s0 = smov 2   ;;  %s885_s16 = smov 112  }
   0x4   :  { %v33_v14 = vrot.slane %v32_v4, 4  ;;  %v66_v15 = vrot.slane %v65_v5, 4  ;;  %v39_v16 = vadd.f32 %v964_v11, %v959_v10  ;;  %v72_v17 = vmax.f32 %v959_v10, %v964_v11  ;;  %s886_s17 = smov 48   ;;  %s887_s28 = smov 32  }
   0x5   :  { %v47_v18 = vrot.slane %v46_v8, 4  ;;  %v80_v19 = vrot.slane %v79_v9, 4  ;;  %v26_v20 = vrot.slane %v25_v12, 4  ;;  %v59_v21 = vrot.slane %v58_v13, 4 }
   0x6   :  { %v34_v22 = vadd.f32 %v33_v14, %v32_v4  ;;  %v67_v23 = vmax.f32 %v65_v5, %v66_v15  ;;  %v40_v24 = vrot.slane %v39_v16, 4  ;;  %v73_v25 = vrot.slane %v72_v17, 4 }
   0x7   :  { %v48_v26 = vadd.f32 %v47_v18, %v46_v8  ;;  %v81_v27 = vmax.f32 %v79_v9, %v80_v19  ;;  %v27_v28 = vadd.f32 %v26_v20, %v25_v12  ;;  %v60_v29 = vmax.f32 %v58_v13, %v59_v21  ;;  %v808_v19 = vld [vmem:[%s1327_s1 + $0xc0] sm:$0xff] }
   0x8   :  { %v35_v30 = vrot.slane %v34_v22, 2  ;;  %v68_v31 = vrot.slane %v67_v23, 2  ;;  %v41_v32 = vadd.f32 %v40_v24, %v39_v16  ;;  %v74_v33 = vmax.f32 %v72_v17, %v73_v25  ;;  %v812_v25 = vld [vmem:[%s1327_s1 + $0xe0] sm:$0xff] }
   0x9   :  { %v49_v34 = vrot.slane %v48_v26, 2  ;;  %v82_v35 = vrot.slane %v81_v27, 2  ;;  %v28_v36 = vrot.slane %v27_v28, 2  ;;  %v61_v37 = vrot.slane %v60_v29, 2 }
   0xa   :  { %v36_v38 = vadd.f32 %v35_v30, %v34_v22  ;;  %v69_v39 = vmax.f32 %v67_v23, %v68_v31  ;;  %v42_v40 = vrot.slane %v41_v32, 2  ;;  %v75_v41 = vrot.slane %v74_v33, 2  ;;  %v813_v30 = vld [vmem:[%s1327_s1 + $0xe8] sm:$0xff]  ;;  %v163_v31 = vld [vmem:[%s1327_s1] sm:$0xff] }
   0xb   :  { %v50_v42 = vadd.f32 %v49_v34, %v48_v26  ;;  %v83_v43 = vmax.f32 %v81_v27, %v82_v35  ;;  %v29_v44 = vadd.f32 %v28_v36, %v27_v28  ;;  %v62_v45 = vmax.f32 %v60_v29, %v61_v37 }
   0xc   :  { %v37_v46 = vrot.slane %v36_v38, 1  ;;  %v70_v47 = vrot.slane %v69_v39, 1  ;;  %v43_v48 = vadd.f32 %v42_v40, %v41_v32  ;;  %v76_v49 = vmax.f32 %v74_v33, %v75_v41  ;;  %v785_v32 = vld [vmem:[%s1327_s1 + $0x8] sm:$0xff]  ;;  %v791_v41 = vld [vmem:[%s1327_s1 + $0x38] sm:$0xff] }
   0xd   :  { %v51_v50 = vrot.slane %v50_v42, 1  ;;  %v84_v51 = vrot.slane %v83_v43, 1  ;;  %v30_v52 = vrot.slane %v29_v44, 1  ;;  %v63_v53 = vrot.slane %v62_v45, 1 }
   0xe   :  { %v38_v54 = vadd.f32 %v37_v46, %v36_v38  ;;  %v71_v55 = vmax.f32 %v69_v39, %v70_v47  ;;  %v44_v56 = vrot.slane %v43_v48, 1  ;;  %v77_v57 = vrot.slane %v76_v49, 1  ;;  %v814_v46 = vld [vmem:[%s1327_s1 + $0xf0] sm:$0xff] }
   0xf   :  { %v52_v58 = vadd.f32 %v51_v50, %v50_v42  ;;  %v85_v59 = vmax.f32 %v83_v43, %v84_v51  ;;  %v31_v60 = vadd.f32 %v30_v52, %v29_v44  ;;  %v64_v61 = vmax.f32 %v62_v45, %v63_v53  ;;  %v792_v42 = vld [vmem:[%s1327_s1 + $0x40] sm:$0xff]  ;;  %v798_v43 = vld [vmem:[%s1327_s1 + $0x70] sm:$0xff]  ;;  %v815_v50 = vld [vmem:[%s1327_s1 + $0xf8] sm:$0xff] }
  0x10   :  { %v55_v62 = vmul.f32 0.0625, %v38_v54  ;;  %v45_v63 = vadd.f32 %v44_v56, %v43_v48  ;;  %v78_v4 = vmax.f32 %v76_v49, %v77_v57  ;;  %v786_v47 = vld [vmem:[%s1327_s1 + $0x10] sm:$0xff]  ;;  %v799_v48 = vld [vmem:[%s1327_s1 + $0x78] sm:$0xff]  ;;  %vm149_vm7 = vcmask 1031168   ;;  %v793_v51 = vld [vmem:[%s1327_s1 + $0x48] sm:$0xff] }
  0x11   :  { %v57_v5 = vmul.f32 0.0625, %v52_v58  ;;  %v101_v8 = vsel %vm99_vm0, %v85_v59, %v71_v55  ;;  %v54_v9 = vmul.f32 0.0625, %v31_v60  ;;  %v787_v54 = vld [vmem:[%s1327_s1 + $0x18] sm:$0xff]  ;;  %vm158_vm8 = vcmask 1022976  }
  0x12   :  { %v56_v12 = vmul.f32 0.0625, %v45_v63  ;;  %v100_v13 = vsel %vm99_vm0, %v78_v4, %v64_v61  ;;  %v794_v61 = vld [vmem:[%s1327_s1 + $0x50] sm:$0xff]  ;;  %v800_v4 = vld [vmem:[%s1327_s1 + $0x80] sm:$0xff]  ;;  %vm259_vm9 = vcmask 261120   ;;  %vm217_vm10 = vcmask 392192  }
  0x13   :  { %v92_v14 = vsel %vm90_vm1, %v57_v5, %v55_v62  ;;  %vm301_vm11 = vcmask 130048   ;;  %vm375_vm12 = vcmask 916480   ;;  %vm417_vm13 = vcmask 785408  }
  0x14   :  { %v106_v15 = vsel %vm104_vm2, %v92_v14, %v101_v8  ;;  %v91_v16 = vsel %vm90_vm1, %v56_v12, %v54_v9  ;;  %v820_v14 = vld [vmem:[%s1327_s1 + $0x120] sm:$0xff]  ;;  %vm459_vm14 = vcmask 654336  }
  0x15   :  { %118 = vrot.lane.b32.xlu1 %v106_v15, %s879_s0  ;;  %108 = vrot.lane.b32.xlu0 %v106_v15, %s880_s5  ;;  %v105_v17 = vsel %vm104_vm2, %v91_v16, %v100_v13  ;;  %v819_v13 = vld [vmem:[%s1327_s1 + $0x118] sm:$0xff] }
  0x16   :  { %v976_v18 = vcombine.low %v105_v17, %v106_v15 }
  0x18   :  { %v984_v20 = vmul.f32 %v808_v19, %v976_v18  ;;  %v355_v9 = vmul.f32 %v815_v50, %v976_v18  ;;  %v187_v19 = vmul.f32 %v787_v54, %v976_v18  ;;  %v796_v54 = vld [vmem:[%s1327_s1 + $0x60] sm:$0xff] }
  0x19   :  { %121 = vrot.lane.b32.xlu1 %v105_v17, %s879_s0  ;;  %112 = vrot.lane.b32.xlu0 %v105_v17, %s880_s5 }
  0x1d   :  { %130 = vrot.lane.b32.xlu1 %v105_v17, %s881_s6  ;;  %127 = vrot.lane.b32.xlu0 %v106_v15, %s881_s6  ;;  %s888_s6 = smov 16  }
  0x21   :  { %138 = vrot.lane.b32.xlu1 %v106_v15, %s882_s7  ;;  %136 = vrot.lane.b32.xlu0 %v105_v17, %s882_s7 }
  0x25   :  { %147 = vrot.lane.b32.xlu1 %v106_v15, %s883_s8  ;;  %145 = vrot.lane.b32.xlu0 %v105_v17, %s883_s8  ;;  %s890_s8 = smov 80  }
  0x29   :  { %156 = vrot.lane.b32.xlu1 %v106_v15, %s884_s9  ;;  %154 = vrot.lane.b32.xlu0 %v105_v17, %s884_s9 }
  0x87   :  { %v119_v21 = vpop.permute.xlu1 %118  ;;  %v109_v22 = vpop.permute.xlu0 %108 }
  0x8b   :  { %v122_v23 = vpop.permute.xlu1 %121  ;;  %v113_v24 = vpop.permute.xlu0 %112 }
  0x8c   :  { %v124_v26 = vsel %vm123_vm3, %v122_v23, %v119_v21  ;;  %v126_v27 = vsel %vm123_vm3, %v119_v21, %v122_v23  ;;  %v115_v28 = vsel %vm114_vm4, %v113_v24, %v109_v22  ;;  %v117_v29 = vsel %vm114_vm4, %v109_v22, %v113_v24  ;;  %v816_v21 = vld [vmem:[%s1327_s1 + $0x100] sm:$0xff] }
  0x8d   :  { %v998_v33 = vcombine.low %v126_v27, %v124_v26  ;;  %v1000_v34 = vcombine.low %v117_v29, %v115_v28  ;;  %v788_v22 = vld [vmem:[%s1327_s1 + $0x20] sm:$0xff]  ;;  %v238_v24 = vmul.f32 %v794_v61, %v976_v18  ;;  %v801_v29 = vld [vmem:[%s1327_s1 + $0x88] sm:$0xff]  ;;  %v818_v61 = vld [vmem:[%s1327_s1 + $0x110] sm:$0xff] }
  0x8f   :  { %v131_v35 = vpop.permute.xlu1 %130  ;;  %v128_v36 = vpop.permute.xlu0 %127  ;;  %v343_v37 = vmul.f32 %v812_v25, %v1000_v34  ;;  %v347_v38 = vmul.f32 %v813_v30, %v998_v33  ;;  %v167_v39 = vmul.f32 %v1000_v34, %v163_v31  ;;  %v174_v40 = vmul.f32 %v785_v32, %v998_v33  ;;  %v821_v32 = vld [vmem:[%s1327_s1 + $0x128] sm:$0xff] }
  0x90   :  { %v133_v44 = vsel %vm132_vm5, %v131_v35, %v128_v36  ;;  %v135_v45 = vsel %vm132_vm5, %v128_v36, %v131_v35  ;;  %v226_v55 = vmul.f32 %v791_v41, %v1000_v34  ;;  %v230_v56 = vmul.f32 %v792_v42, %v998_v33  ;;  %v822_v41 = vld [vmem:[%s1327_s1 + $0x130] sm:$0xff] }
  0x91   :  { %v1026_v49 = vcombine.low %v135_v45, %v133_v44  ;;  %v348_v52 = vadd.f32 %v347_v38, %v343_v37  ;;  %v175_v53 = vadd.f32 %v174_v40, %v167_v39  ;;  %v268_v62 = vmul.f32 %v798_v43, %v1000_v34  ;;  %v817_v38 = vld [vmem:[%s1327_s1 + $0x108] sm:$0xff] }
  0x92   :  { %v272_v63 = vmul.f32 %v799_v48, %v998_v33  ;;  %v231_v23 = vadd.f32 %v230_v56, %v226_v55  ;;  %v385_v30 = vmul.f32 %v819_v13, %v1000_v34  ;;  %v389_v31 = vmul.f32 %v820_v14, %v998_v33  ;;  %v789_v39 = vld [vmem:[%s1327_s1 + $0x28] sm:$0xff]  ;;  %v802_v13 = vld [vmem:[%s1327_s1 + $0x90] sm:$0xff] }
  0x93   :  { %v139_v57 = vpop.permute.xlu1 %138  ;;  %v137_v58 = vpop.permute.xlu0 %136  ;;  %v351_v59 = vmul.f32 %v814_v46, %v1026_v49  ;;  %v181_v60 = vmul.f32 %v786_v47, %v1026_v49  ;;  %v234_v12 = vmul.f32 %v793_v51, %v1026_v49  ;;  %v276_v25 = vmul.f32 %v800_v4, %v1026_v49  ;;  %v795_v46 = vld [vmem:[%s1327_s1 + $0x58] sm:$0xff] }
  0x94   :  { %v141_v5 = vsel %vm140_vm6, %v137_v58, %v139_v57  ;;  %v144_v8 = vsel %vm140_vm6, %v139_v57, %v137_v58  ;;  %v273_v28 = vadd.f32 %v272_v63, %v268_v62  ;;  %v280_v48 = vmul.f32 %v801_v29, %v976_v18  ;;  %v826_v57 = vld [vmem:[%s1327_s1 + $0x150] sm:$0xff]  ;;  %v827_v58 = vld [vmem:[%s1327_s1 + $0x158] sm:$0xff] }
  0x95   :  { %v1059_v15 = vcombine.low %v141_v5, %v144_v8  ;;  %v352_v16 = vadd.f32 %v351_v59, %v348_v52  ;;  %v182_v17 = vadd.f32 %v181_v60, %v175_v53  ;;  %v235_v40 = vadd.f32 %v234_v12, %v231_v23  ;;  %v790_v62 = vld [vmem:[%s1327_s1 + $0x30] sm:$0xff]  ;;  %v797_v12 = vld [vmem:[%s1327_s1 + $0x68] sm:$0xff] }
  0x96   :  { %v277_v47 = vadd.f32 %v276_v25, %v273_v28  ;;  %v393_v55 = vmul.f32 %v821_v32, %v1026_v49  ;;  %v397_v56 = vmul.f32 %v822_v41, %v976_v18  ;;  %v390_v14 = vadd.f32 %v389_v31, %v385_v30  ;;  %v803_v31 = vld [vmem:[%s1327_s1 + $0x98] sm:$0xff] }
  0x97   :  { %v148_v26 = vpop.permute.xlu1 %147  ;;  %v146_v27 = vpop.permute.xlu0 %145  ;;  %v356_v37 = vadd.f32 %v355_v9, %v352_v16  ;;  %v359_v43 = vmul.f32 %v816_v21, %v1059_v15  ;;  %v188_v44 = vadd.f32 %v187_v19, %v182_v17  ;;  %v194_v45 = vmul.f32 %v788_v22, %v1059_v15  ;;  %v828_v22 = vld [vmem:[%s1327_s1 + $0x160] sm:$0xff] }
  0x98   :  { %v150_v35 = vsel %vm149_vm7, %v146_v27, %v148_v26  ;;  %v153_v36 = vsel %vm149_vm7, %v148_v26, %v146_v27  ;;  %v239_v63 = vadd.f32 %v238_v24, %v235_v40  ;;  %v242_v4 = vmul.f32 %v795_v46, %v1059_v15  ;;  %v829_v27 = vld [vmem:[%s1327_s1 + $0x168] sm:$0xff]  ;;  %v807_v46 = vld [vmem:[%s1327_s1 + $0xb8] sm:$0xff] }
  0x99   :  { %v1089_v42 = vcombine.low %v150_v35, %v153_v36  ;;  %v360_v8 = vadd.f32 %v359_v43, %v356_v37  ;;  %v195_v9 = vadd.f32 %v194_v45, %v188_v44  ;;  %v281_v17 = vadd.f32 %v280_v48, %v277_v47  ;;  %v823_v35 = vld [vmem:[%s1327_s1 + $0x138] sm:$0xff]  ;;  %v805_v40 = vld [vmem:[%s1327_s1 + $0xa8] sm:$0xff]  ;;  %v824_v43 = vld [vmem:[%s1327_s1 + $0x140] sm:$0xff] }
  0x9a   :  { %v427_v19 = vmul.f32 %v826_v57, %v1000_v34  ;;  %v431_v21 = vmul.f32 %v827_v58, %v998_v33  ;;  %v243_v28 = vadd.f32 %v242_v4, %v239_v63  ;;  %v284_v30 = vmul.f32 %v802_v13, %v1059_v15  ;;  %v806_v45 = vld [vmem:[%s1327_s1 + $0xb0] sm:$0xff]  ;;  %v811_v57 = vld [vmem:[%s1327_s1 + $0xd8] sm:$0xff] }
  0x9b   :  { %v157_v50 = vpop.permute.xlu1 %156  ;;  %v155_v51 = vpop.permute.xlu0 %154  ;;  %v363_v52 = vmul.f32 %v817_v38, %v1089_v42  ;;  %v201_v53 = vmul.f32 %v789_v39, %v1089_v42  ;;  %v246_v16 = vmul.f32 %v796_v54, %v1089_v42  ;;  %v394_v32 = vadd.f32 %v393_v55, %v390_v14  ;;  %v804_v38 = vld [vmem:[%s1327_s1 + $0xa0] sm:$0xff] }
  0x9c   :  { %v159_v59 = vsel %vm158_vm8, %v155_v51, %v157_v50  ;;  %v162_v60 = vsel %vm158_vm8, %v157_v50, %v155_v51  ;;  %v435_v39 = vmul.f32 %v828_v22, %v1026_v49  ;;  %v439_v44 = vmul.f32 %v829_v27, %v976_v18  ;;  %v809_v18 = vld [vmem:[%s1327_s1 + $0xc8] sm:$0xff]  ;;  %v810_v51 = vld [vmem:[%s1327_s1 + $0xd0] sm:$0xff]  ;;  %v832_v22 = vld [vmem:[%s1327_s1 + $0x180] sm:$0xff] }
  0x9d   :  { %v1119_v5 = vcombine.low %v159_v59, %v162_v60  ;;  %v364_v23 = vadd.f32 %v363_v52, %v360_v8  ;;  %v202_v25 = vadd.f32 %v201_v53, %v195_v9  ;;  %v247_v41 = vadd.f32 %v246_v16, %v243_v28  ;;  %v825_v59 = vld [vmem:[%s1327_s1 + $0x148] sm:$0xff] }
  0x9e   :  { %v288_v47 = vmul.f32 %v803_v31, %v1089_v42  ;;  %v401_v48 = vmul.f32 %v823_v35, %v1059_v15  ;;  %v432_v50 = vadd.f32 %v431_v21, %v427_v19  ;;  %v285_v53 = vadd.f32 %v284_v30, %v281_v17 }
  0x9f   :  { %v367_v24 = vmul.f32 %v818_v61, %v1119_v5  ;;  %v208_v26 = vmul.f32 %v790_v62, %v1119_v5  ;;  %v250_v29 = vmul.f32 %v797_v12, %v1119_v5  ;;  %v292_v54 = vmul.f32 %v804_v38, %v1119_v5  ;;  %v830_v61 = vld [vmem:[%s1327_s1 + $0x170] sm:$0xff] }
  0xa0   :  { %v398_v55 = vadd.f32 %v397_v56, %v394_v32  ;;  %v436_v60 = vadd.f32 %v435_v39, %v432_v50  ;;  %v310_v62 = vmul.f32 %v805_v40, %v1000_v34  ;;  %v314_v63 = vmul.f32 %v806_v45, %v998_v33 }
  0xa1   :  { %v368_v36 = vadd.f32 %v367_v24, %v364_v23  ;;  %v209_v37 = vadd.f32 %v208_v26, %v202_v25  ;;  %v251_v52 = vadd.f32 %v250_v29, %v247_v41  ;;  %v405_v56 = vmul.f32 %v824_v43, %v1089_v42 }
  0xa2   :  { %v318_v4 = vmul.f32 %v807_v46, %v1026_v49  ;;  %v326_v8 = vmul.f32 %v809_v18, %v1059_v15  ;;  %v330_v9 = vmul.f32 %v810_v51, %v1089_v42  ;;  %v289_v12 = vadd.f32 %v288_v47, %v285_v53  ;;  %v831_v49 = vld [vmem:[%s1327_s1 + $0x178] sm:$0xff]  ;;  %s889_s1 = smov 96  }
  0xa3   :  { %371 = vrot.lane.b32.xlu0 %v368_v36, %s885_s16  ;;  %215 = vrot.lane.b32.xlu1 %v209_v37, %s886_s17  ;;  %v211_v58 = vcombine.high %v209_v37, %v209_v37  ;;  %v315_v13 = vadd.f32 %v314_v63, %v310_v62  ;;  %v334_v14 = vmul.f32 %v811_v57, %v1119_v5 }
  0xa4   :  { %v402_v16 = vadd.f32 %v401_v48, %v398_v55  ;;  %v409_v34 = vmul.f32 %v825_v59, %v1119_v5  ;;  %v443_v33 = vmul.f32 %v830_v61, %v1059_v15  ;;  %v293_v17 = vadd.f32 %v292_v54, %v289_v12 }
  0xa5   :  { %v253_v19 = vcombine.high %v251_v52, %v251_v52  ;;  %v440_v21 = vadd.f32 %v439_v44, %v436_v60  ;;  %v319_v23 = vadd.f32 %v318_v4, %v315_v13  ;;  %v447_v25 = vmul.f32 %v831_v49, %v1089_v42 }
  0xa6   :  { %v406_v24 = vadd.f32 %v405_v56, %v402_v16  ;;  %v451_v27 = vmul.f32 %v832_v22, %v1119_v5  ;;  %v370_v28 = vcombine.high %v368_v36, %v368_v36  ;;  %v295_v29 = vcombine.high %v293_v17, %v293_v17 }
  0xa7   :  { %257 = vrot.lane.b32.xlu1 %v251_v52, %s887_s28  ;;  %212 = vrot.lane.b32.xlu0 %v211_v58, %s886_s17  ;;  %v323_v15 = vadd.f32 %v984_v20, %v319_v23  ;;  %v444_v30 = vadd.f32 %v443_v33, %v440_v21  ;;  %v1204_v20 = vld [vmem:[%s1328_s2] sm:$0xff] }
  0xa8   :  { %v410_v26 = vadd.f32 %v409_v34, %v406_v24 }
  0xa9   :  { %v327_v31 = vadd.f32 %v326_v8, %v323_v15  ;;  %v448_v32 = vadd.f32 %v447_v25, %v444_v30  ;;  %v891_v30 = vmov 1966171168  }
  0xaa   :  { %v412_v37 = vcombine.high %v410_v26, %v410_v26 }
  0xab   :  { %299 = vrot.lane.b32.xlu1 %v293_v17, %s888_s6  ;;  %254 = vrot.lane.b32.xlu0 %v253_v19, %s887_s28  ;;  %v331_v35 = vadd.f32 %v330_v9, %v327_v31  ;;  %v452_v38 = vadd.f32 %v451_v27, %v448_v32  ;;  %v491_v31 = vunpack.c.l.s4 %v891_v30  ;;  %v493_v32 = vlaneseq }
  0xad   :  { %v335_v39 = vadd.f32 %v334_v14, %v331_v35  ;;  %v454_v42 = vcombine.high %v452_v38, %v452_v38  ;;  %v492_v35 = vunpack.c.0.s8 %v491_v31 }
  0xaf   :  { %373 = vrot.lane.b32.xlu1 %v370_v28, %s885_s16  ;;  %296 = vrot.lane.b32.xlu0 %v295_v29, %s888_s6  ;;  %v337_v55 = vcombine.high %v335_v39, %v335_v39 }
  0xb3   :  { %415 = vrot.lane.b32.xlu1 %v412_v37, %s889_s1  ;;  %413 = vrot.lane.b32.xlu0 %v410_v26, %s889_s1  ;;  %v494_v37 = vshrl.u32 %v493_v32, 7 }
  0xb7   :  { %457 = vrot.lane.b32.xlu1 %v454_v42, %s890_s8  ;;  %455 = vrot.lane.b32.xlu0 %v452_v38, %s890_s8 }
  0xbb   :  { %639 = vrot.lane.b32.xlu1 %v1204_v20, %s882_s7 }
 0x115   :  { %v372_v5 = vpop.permute.xlu0 %371  ;;  %v216_v36 = vpop.permute.xlu1 %215 }
 0x119   :  { %v258_v40 = vpop.permute.xlu1 %257  ;;  %v213_v41 = vpop.permute.xlu0 %212 }
 0x11a   :  { %v218_v47 = vsel %vm217_vm10, %v216_v36, %v213_v41  ;;  %v221_v48 = vsel %vm217_vm10, %v213_v41, %v216_v36  ;;  %v518_v41 = vsub.s32 1, %v494_v37 }
 0x11d   :  { %v300_v43 = vpop.permute.xlu1 %299  ;;  %v255_v44 = vpop.permute.xlu0 %254 }
 0x11e   :  { %v260_v45 = vsel %vm259_vm9, %v258_v40, %v255_v44  ;;  %v263_v46 = vsel %vm259_vm9, %v255_v44, %v258_v40  ;;  %v514_v40 = vsub.s32 0, %v494_v37 }
 0x11f   :  { %v264_v50 = vadd.f32 %v263_v46, %v221_v48  ;;  %v265_v18 = vadd.f32 %v260_v45, %v218_v47 }
 0x121   :  { %v374_v51 = vpop.permute.xlu1 %373  ;;  %v297_v52 = vpop.permute.xlu0 %296 }
 0x122   :  { %v302_v53 = vsel %vm301_vm11, %v300_v43, %v297_v52  ;;  %v305_v54 = vsel %vm301_vm11, %v297_v52, %v300_v43  ;;  %v376_v63 = vsel %vm375_vm12, %v372_v5, %v374_v51  ;;  %v380_v56 = vsel %vm375_vm12, %v374_v51, %v372_v5 }
 0x123   :  { %v306_v57 = vadd.f32 %v305_v54, %v264_v50  ;;  %v307_v58 = vadd.f32 %v302_v53, %v265_v18 }
 0x125   :  { %v339_v59 = vadd.f32 %v335_v39, %v306_v57  ;;  %v340_v60 = vadd.f32 %v337_v55, %v307_v58  ;;  %v416_v61 = vpop.permute.xlu1 %415  ;;  %v414_v62 = vpop.permute.xlu0 %413  ;;  %v495_v39 = vsub.s32 %v492_v35, %v494_v37 }
 0x126   :  { %v418_v9 = vsel %vm417_vm13, %v414_v62, %v416_v61  ;;  %v422_v12 = vsel %vm417_vm13, %v416_v61, %v414_v62  ;;  %v1251_v61 = vld [vmem:[%s1329_s3] sm:$0xff]  ;;  %v892_v62 = vmov 0  }
 0x127   :  { %v381_v4 = vadd.f32 %v376_v63, %v339_v59  ;;  %v382_v8 = vadd.f32 %v380_v56, %v340_v60  ;;  %854 = vset.pattern.permute.xlu1 %v892_v62  ;;  %853 = vset.pattern.permute.xlu0 %v892_v62 }
 0x129   :  { %v423_v13 = vadd.f32 %v418_v9, %v381_v4  ;;  %v424_v14 = vadd.f32 %v422_v12, %v382_v8  ;;  %v458_v16 = vpop.permute.xlu1 %457  ;;  %v456_v34 = vpop.permute.xlu0 %455 }
 0x12a   :  { %v460_v33 = vsel %vm459_vm14, %v456_v34, %v458_v16  ;;  %v464_v49 = vsel %vm459_vm14, %v458_v16, %v456_v34 }
 0x12b   :  { %v465_v17 = vadd.f32 %v460_v33, %v423_v13  ;;  %v466_v19 = vadd.f32 %v464_v49, %v424_v14 }
 0x12d   :  { %v469_v21 = vrot.slane %v465_v17, 2  ;;  %v470_v22 = vrot.slane %v466_v19, 2  ;;  %v640_v63 = vpop.permute.xlu1 %639 }
 0x12f   :  { %v473_v23 = vadd.f32 %v469_v21, %v465_v17  ;;  %v474_v24 = vadd.f32 %v470_v22, %v466_v19 }
 0x131   :  { %v833_v25 = vmul.f32 -1.442695, %v473_v23  ;;  %v834_v15 = vmul.f32 -1.442695, %v474_v24 }
 0x133   :  { %855 = vpow2.f32 %v833_v25 }
 0x134   :  { %857 = vpow2.f32 %v834_v15 }
 0x13d   :  { %v856_v26 = vpop.eup %855 }
 0x13e   :  { %v858_v27 = vpop.eup %857  ;;  %v481_v28 = vadd.f32 1.0, %v856_v26 }
 0x13f   :  { %v482_v29 = vadd.f32 1.0, %v858_v27 }
 0x140   :  { %859 = vrcp.f32 %v481_v28 }
 0x141   :  { %861 = vrcp.f32 %v482_v29 }
 0x14a   :  { %v860_v38 = vpop.eup %859 }
 0x14b   :  { %v862_v42 = vpop.eup %861 }
 0x14c   :  { %v489_v5 = vcombine.low %v860_v38, %v862_v42 }
 0x14e   :  { %v496_v36 = vrot.slane %v489_v5, %v495_v39 }
 0x150   :  { %v504_v43 = vrot.slane %v496_v36, %v495_v39  ;;  %v497_v44 = vcombine.high %v496_v36, %v496_v36 }
 0x152   :  { %v515_v45 = vrot.slane %v504_v43, %v514_v40  ;;  %v519_v46 = vrot.slane %v504_v43, %v518_v41  ;;  %v511_v47 = vrot.slane %v497_v44, %v495_v39 }
 0x154   :  { %v1209_v48 = vmul.f32 %v515_v45, %v950_v7  ;;  %v1212_v50 = vmul.f32 %v519_v46, %v926_v1  ;;  %v1215_v18 = vmul.f32 %v515_v45, %v945_v6  ;;  %v1218_v51 = vmul.f32 %v519_v46, %v921_v0 }
 0x155   :  { %v523_v54 = vrot.slane %v511_v47, %v514_v40  ;;  %v527_v55 = vrot.slane %v511_v47, %v518_v41 }
 0x156   :  { %v543_v52 = vadd.f32 %v1212_v50, %v1209_v48  ;;  %v540_v53 = vadd.f32 %v1218_v51, %v1215_v18  ;;  %v557_v1 = vmax.f32 %v1215_v18, %v1218_v51  ;;  %v560_v6 = vmax.f32 %v1209_v48, %v1212_v50 }
 0x157   :  { %v1229_v7 = vmul.f32 %v523_v54, %v959_v10  ;;  %v1232_v0 = vmul.f32 %v527_v55, %v931_v2  ;;  %v1239_v59 = vmul.f32 %v523_v54, %v964_v11  ;;  %v1242_v60 = vmul.f32 %v527_v55, %v936_v3  ;;  %v1258_v3 = vld [vmem:[%s1329_s3 + $0x8] sm:$0xff] }
 0x158   :  { %544 = vadd.xlane.f32.xlu1 %v543_v52  ;;  %541 = vadd.xlane.f32.xlu0 %v540_v53  ;;  %v570_v11 = vld [vmem:[%s1328_s2 + $0x8] sm:$0xff] }
 0x159   :  { %v563_v57 = vmax.f32 %v1229_v7, %v1232_v0  ;;  %v546_v58 = vadd.f32 %v1232_v0, %v1229_v7  ;;  %v549_v2 = vadd.f32 %v1242_v60, %v1239_v59  ;;  %v566_v10 = vmax.f32 %v1239_v59, %v1242_v60 }
 0x15c   :  { %558 = vmax.xlane.f32.xlu1 %v557_v1  ;;  %561 = vmax.xlane.f32.xlu0 %v560_v6 }
 0x160   :  { %564 = vmax.xlane.f32.xlu1 %v563_v57  ;;  %547 = vadd.xlane.f32.xlu0 %v546_v58 }
 0x164   :  { %550 = vadd.xlane.f32.xlu0 %v549_v2 }
 0x168   :  { %567 = vmax.xlane.f32.xlu0 %v566_v10 }
 0x171   :  { %695 = vrot.lane.b32.xlu1 %v1251_v61, %s882_s7 }
 0x175   :  { %697 = vrot.lane.b32.xlu1 %v1258_v3, %s882_s7 }
 0x17e   :  { %641 = vrot.lane.b32.xlu0 %v570_v11, %s882_s7 }
 0x1e5   :  { %v545_v56 = vpop.xlane.xlu1 %544  ;;  %v542_v4 = vpop.xlane.xlu0 %541 }
 0x1e6   :  { %v554_v8 = vmul.f32 0.00390625, %v545_v56  ;;  %v553_v9 = vmul.f32 0.00390625, %v542_v4 }
 0x1e8   :  { %v574_v12 = vmul.f32 %v570_v11, %v554_v8  ;;  %v573_v13 = vmul.f32 %v1204_v20, %v553_v9  ;;  %v645_v37 = vmul.f32 %v640_v63, %v553_v9 }
 0x1e9   :  { %v559_v14 = vpop.xlane.xlu1 %558  ;;  %v562_v16 = vpop.xlane.xlu0 %561 }
 0x1ea   :  { %v582_v34 = vsel %vm132_vm5, %v574_v12, 0.0  ;;  %v581_v33 = vsel %vm132_vm5, %v573_v13, 0.0  ;;  %v577_v49 = vmul.f32 %v1204_v20, %v559_v14  ;;  %v578_v19 = vmul.f32 %v570_v11, %v562_v16 }
 0x1eb   :  { %v583_v17 = vadd.f32 %v582_v34, %v581_v33  ;;  %v649_v42 = vmul.f32 %v640_v63, %v559_v14  ;;  %v653_v47 = vsel %vm132_vm5, %v645_v37, 0.0 }
 0x1ec   :  { %v599_v21 = vsel %vm132_vm5, %v577_v49, 0.0  ;;  %v600_v23 = vsel %vm132_vm5, %v578_v19, 0.0 }
 0x1ed   :  { %v584_v22 = vrot.slane %v583_v17, 4  ;;  %v548_v24 = vpop.xlane.xlu0 %547  ;;  %v601_v25 = vadd.f32 %v600_v23, %v599_v21  ;;  %v565_v28 = vpop.xlane.xlu1 %564 }
 0x1ee   :  { %v555_v15 = vmul.f32 0.00390625, %v548_v24  ;;  %v579_v38 = vmul.f32 %v1204_v20, %v565_v28  ;;  %v651_v54 = vmul.f32 %v640_v63, %v565_v28 }
 0x1ef   :  { %v585_v26 = vadd.f32 %v584_v22, %v583_v17  ;;  %v602_v27 = vrot.slane %v601_v25, 4 }
 0x1f0   :  { %v575_v31 = vmul.f32 %v1204_v20, %v555_v15  ;;  %v647_v44 = vmul.f32 %v640_v63, %v555_v15  ;;  %v608_v52 = vsel %vm132_vm5, %v579_v38, 0.0  ;;  %v671_v20 = vsel %vm132_vm5, %v649_v42, 0.0 }
 0x1f1   :  { %v551_v29 = vpop.xlane.xlu0 %550  ;;  %v603_v30 = vadd.f32 %v602_v27, %v601_v25  ;;  %v586_v35 = vrot.slane %v585_v26, 2 }
 0x1f2   :  { %v556_v32 = vmul.f32 0.00390625, %v551_v29  ;;  %v590_v40 = vsel %vm132_vm5, %v575_v31, 0.0 }
 0x1f3   :  { %v604_v36 = vrot.slane %v603_v30, 2  ;;  %v587_v46 = vadd.f32 %v586_v35, %v585_v26 }
 0x1f4   :  { %v576_v39 = vmul.f32 %v570_v11, %v556_v32 }
 0x1f5   :  { %v568_v5 = vpop.xlane.xlu0 %567  ;;  %v605_v57 = vadd.f32 %v604_v36, %v603_v30  ;;  %v588_v9 = vrot.slane %v587_v46, 1  ;;  %v696_v36 = vpop.permute.xlu1 %695 }
 0x1f6   :  { %v591_v41 = vsel %vm132_vm5, %v576_v39, 0.0  ;;  %v580_v43 = vmul.f32 %v570_v11, %v568_v5  ;;  %v662_v11 = vsel %vm132_vm5, %v647_v44, 0.0 }
 0x1f7   :  { %v592_v45 = vadd.f32 %v591_v41, %v590_v40  ;;  %v606_v17 = vrot.slane %v605_v57, 1  ;;  %v589_v25 = vadd.f32 %v588_v9, %v587_v46 }
 0x1f8   :  { %v609_v53 = vsel %vm132_vm5, %v580_v43, 0.0 }
 0x1f9   :  { %v593_v55 = vrot.slane %v592_v45, 4  ;;  %v610_v1 = vadd.f32 %v609_v53, %v608_v52  ;;  %v642_v6 = vpop.permute.xlu0 %641  ;;  %v607_v31 = vadd.f32 %v606_v17, %v605_v57  ;;  %v617_v43 = vmax.f32 %v589_v25, 0.0 }
 0x1fa   :  { %v646_v58 = vmul.f32 %v642_v6, %v554_v8  ;;  %v648_v2 = vmul.f32 %v642_v6, %v556_v32  ;;  %v650_v10 = vmul.f32 %v642_v6, %v562_v16  ;;  %v652_v4 = vmul.f32 %v642_v6, %v568_v5 }
 0x1fb   :  { %v594_v62 = vadd.f32 %v593_v55, %v592_v45  ;;  %v611_v56 = vrot.slane %v610_v1, 4  ;;  %v680_v8 = vsel %vm132_vm5, %v651_v54, 0.0  ;;  %v619_v46 = vmax.f32 %v607_v31, 0.0 }
 0x1fc   :  { %v654_v12 = vsel %vm132_vm5, %v646_v58, 0.0  ;;  %v663_v13 = vsel %vm132_vm5, %v648_v2, 0.0  ;;  %v672_v14 = vsel %vm132_vm5, %v650_v10, 0.0  ;;  %v681_v19 = vsel %vm132_vm5, %v652_v4, 0.0  ;;  %v698_v4 = vpop.permute.xlu1 %697 }
 0x1fd   :  { %v595_v63 = vrot.slane %v594_v62, 2  ;;  %v612_v34 = vadd.f32 %v611_v56, %v610_v1  ;;  %v655_v33 = vadd.f32 %v654_v12, %v653_v47  ;;  %v664_v49 = vadd.f32 %v663_v13, %v662_v11 }
 0x1fe   :  { %v673_v16 = vadd.f32 %v672_v14, %v671_v20  ;;  %v682_v26 = vadd.f32 %v681_v19, %v680_v8  ;;  %v621_v57 = vmul.f32 %v617_v43, %v1251_v61  ;;  %v625_v10 = vmul.f32 %v619_v46, %v1251_v61 }
 0x1ff   :  { %v596_v21 = vadd.f32 %v595_v63, %v594_v62  ;;  %v613_v22 = vrot.slane %v612_v34, 2  ;;  %v656_v23 = vrot.slane %v655_v33, 4  ;;  %v665_v24 = vrot.slane %v664_v49, 4 }
 0x200   :  { %v674_v15 = vrot.slane %v673_v16, 4  ;;  %v683_v35 = vrot.slane %v682_v26, 4  ;;  %v622_v56 = vmul.f32 %v617_v43, %v1258_v3  ;;  %v626_v14 = vmul.f32 %v619_v46, %v1258_v3 }
 0x201   :  { %v597_v27 = vrot.slane %v596_v21, 1  ;;  %v614_v28 = vadd.f32 %v613_v22, %v612_v34  ;;  %v657_v29 = vadd.f32 %v656_v23, %v655_v33  ;;  %v666_v30 = vadd.f32 %v665_v24, %v664_v49 }
 0x202   :  { %v675_v32 = vadd.f32 %v674_v15, %v673_v16  ;;  %v684_v5 = vadd.f32 %v683_v35, %v682_v26 }
 0x203   :  { %v598_v37 = vadd.f32 %v597_v27, %v596_v21  ;;  %v615_v38 = vrot.slane %v614_v28, 1  ;;  %v658_v39 = vrot.slane %v657_v29, 2  ;;  %v667_v42 = vrot.slane %v666_v30, 2 }
 0x204   :  { %v676_v40 = vrot.slane %v675_v32, 2  ;;  %v685_v52 = vrot.slane %v684_v5, 2 }
 0x205   :  { %v616_v41 = vadd.f32 %v615_v38, %v614_v28  ;;  %v659_v44 = vadd.f32 %v658_v39, %v657_v29  ;;  %v668_v45 = vadd.f32 %v667_v42, %v666_v30  ;;  %v618_v53 = vmax.f32 %v598_v37, 0.0 }
 0x206   :  { %v677_v47 = vadd.f32 %v676_v40, %v675_v32  ;;  %v686_v6 = vadd.f32 %v685_v52, %v684_v5 }
 0x207   :  { %v660_v20 = vrot.slane %v659_v44, 1  ;;  %v669_v54 = vrot.slane %v668_v45, 1  ;;  %v620_v55 = vmax.f32 %v616_v41, 0.0  ;;  %v623_v9 = vmul.f32 %v618_v53, %v1251_v61 }
 0x208   :  { %v678_v1 = vrot.slane %v677_v47, 1  ;;  %v687_v62 = vrot.slane %v686_v6, 1  ;;  %v624_v49 = vmul.f32 %v618_v53, %v1258_v3 }
 0x209   :  { %v661_v58 = vadd.f32 %v660_v20, %v659_v44  ;;  %v670_v2 = vadd.f32 %v669_v54, %v668_v45  ;;  %v627_v63 = vmul.f32 %v620_v55, %v1251_v61  ;;  %v628_v23 = vmul.f32 %v620_v55, %v1258_v3 }
 0x20a   :  { %v679_v11 = vadd.f32 %v678_v1, %v677_v47  ;;  %v688_v34 = vadd.f32 %v687_v62, %v686_v6 }
 0x20b   :  { %v689_v12 = vmax.f32 %v661_v58, 0.0  ;;  %v690_v13 = vmax.f32 %v670_v2, 0.0 }
 0x20c   :  { %v691_v33 = vmax.f32 %v679_v11, 0.0  ;;  %v692_v21 = vmax.f32 %v688_v34, 0.0 }
 0x20d   :  { %v701_v17 = vmul.f32 %v696_v36, %v689_v12  ;;  %v703_v8 = vmul.f32 %v696_v36, %v690_v13  ;;  %v702_v16 = vmul.f32 %v698_v4, %v689_v12  ;;  %v704_v19 = vmul.f32 %v698_v4, %v690_v13 }
 0x20e   :  { %v705_v22 = vmul.f32 %v696_v36, %v691_v33  ;;  %v706_v24 = vmul.f32 %v698_v4, %v691_v33  ;;  %v707_v28 = vmul.f32 %v696_v36, %v692_v21  ;;  %v708_v61 = vmul.f32 %v698_v4, %v692_v21 }
 0x20f   :  { %v709_v25 = vadd.f32 %v701_v17, %v621_v57  ;;  %v711_v15 = vadd.f32 %v703_v8, %v623_v9  ;;  %v710_v26 = vadd.f32 %v702_v16, %v622_v56  ;;  %v712_v27 = vadd.f32 %v704_v19, %v624_v49 }
 0x210   :  { %v713_v29 = vadd.f32 %v705_v22, %v625_v10  ;;  %v714_v30 = vadd.f32 %v706_v24, %v626_v14  ;;  %v715_v31 = vadd.f32 %v707_v28, %v627_v63  ;;  %v716_v35 = vadd.f32 %v708_v61, %v628_v23 }
 0x212   :  { %v717_v32 = vadd.f32 %v713_v29, %v709_v25  ;;  %v718_v37 = vadd.f32 %v714_v30, %v710_v26  ;;  %v719_v38 = vadd.f32 %v715_v31, %v711_v15  ;;  %v720_v42 = vadd.f32 %v716_v35, %v712_v27 }
 0x214   :  { %v835_v39 = vmul.f32 -1.442695, %v717_v32  ;;  %v836_v5 = vmul.f32 -1.442695, %v718_v37  ;;  %v837_v40 = vmul.f32 -1.442695, %v719_v38 }
 0x215   :  { %v838_v3 = vmul.f32 -1.442695, %v720_v42 }
 0x216   :  { %863 = vpow2.f32 %v835_v39 }
 0x217   :  { %865 = vpow2.f32 %v836_v5 }
 0x218   :  { %867 = vpow2.f32 %v837_v40 }
 0x219   :  { %869 = vpow2.f32 %v838_v3 }
 0x220   :  { %v864_v41 = vpop.eup %863 }
 0x221   :  { %v866_v43 = vpop.eup %865  ;;  %v733_v36 = vadd.f32 1.0, %v864_v41 }
 0x222   :  { %v868_v44 = vpop.eup %867  ;;  %v734_v45 = vadd.f32 1.0, %v866_v43 }
 0x223   :  { %v870_v46 = vpop.eup %869  ;;  %871 = vrcp.f32 %v733_v36  ;;  %v735_v47 = vadd.f32 1.0, %v868_v44 }
 0x224   :  { %v736_v52 = vadd.f32 1.0, %v870_v46  ;;  %873 = vrcp.f32 %v734_v45 }
 0x226   :  { %875 = vrcp.f32 %v736_v52 }
 0x227   :  { %877 = vrcp.f32 %v735_v47 }
 0x22d   :  { %v872_v53 = vpop.eup %871 }
 0x22e   :  { %v874_v20 = vpop.eup %873  ;;  %747 = vperm.xlu0 %853, %v872_v53  }
 0x22f   :  { %752 = vperm.xlu1 %854, %v874_v20  }
 0x230   :  { %v876_v54 = vpop.eup %875 }
 0x231   :  { %v878_v55 = vpop.eup %877 }
 0x232   :  { %762 = vperm.xlu0 %853, %v876_v54  }
 0x233   :  { %757 = vperm.xlu1 %854, %v878_v55  }
 0x2ad   :  { %v748_v1 = vpop.permute.xlu0 %747 }
 0x2ae   :  { %v753_v6 = vpop.permute.xlu1 %752  ;;  %v765_v57 = vmul.f32 %v748_v1, %v1215_v18  ;;  %v766_v58 = vmul.f32 %v748_v1, %v1218_v51 }
 0x2af   :  { %v767_v2 = vmul.f32 %v753_v6, %v1209_v48  ;;  %v768_v10 = vmul.f32 %v753_v6, %v1212_v50 }
 0x2b0   :  { %773 = vst [vmem:[%s1330_s4] sm:$0xff] %v765_v57  ;;  %774 = vst [vmem:[%s1330_s4 + $0x8] sm:$0xff] %v766_v58 }
 0x2b1   :  { %775 = vst [vmem:[%s1330_s4 + $0x10] sm:$0xff] %v767_v2  ;;  %776 = vst [vmem:[%s1330_s4 + $0x18] sm:$0xff] %v768_v10  ;;  %v763_v18 = vpop.permute.xlu0 %762 }
 0x2b2   :  { %v758_v48 = vpop.permute.xlu1 %757  ;;  %v771_v50 = vmul.f32 %v763_v18, %v1239_v59  ;;  %v772_v51 = vmul.f32 %v763_v18, %v1242_v60 }
 0x2b3   :  { %v769_v11 = vmul.f32 %v758_v48, %v1229_v7  ;;  %v770_v62 = vmul.f32 %v758_v48, %v1232_v0 }
 0x2b4   :  { %779 = vst [vmem:[%s1330_s4 + $0x30] sm:$0xff] %v771_v50  ;;  %780 = vst [vmem:[%s1330_s4 + $0x38] sm:$0xff] %v772_v51 }
 0x2b5   :  { %777 = vst [vmem:[%s1330_s4 + $0x20] sm:$0xff] %v769_v11  ;;  %778 = vst [vmem:[%s1330_s4 + $0x28] sm:$0xff] %v770_v62 }

</bundles_post_ra>
